<compile_context>
chip_gen: v7x
topology: tpu7x:2x2x1
jax: 0.10.0
libtpu: 0.0.40
codegen_flags: <defaults>
</compile_context>

<pallas_src>
import jax
import jax.numpy as jnp
from jax.experimental import pallas as pl
from jax.experimental.pallas import tpu as pltpu

# Padded (lane-aligned) layer widths.
PAD_IN = 896    # 784 -> 896
PAD_H1 = 512    # 392 -> 512
PAD_H2 = 256    # 196 -> 256
PAD_H3 = 128    # 98  -> 128
PAD_OUT = 128   # 10  -> 128


def mlp_kernel(x_ref,
               w1_ref, b1_ref,
               w2_ref, b2_ref,
               w3_ref, b3_ref,
               w4_ref, b4_ref,
               o_ref):
    # lin1 + ReLU  (bf16 x bf16 -> f32 accumulate)
    h = jnp.dot(x_ref[...], w1_ref[...], preferred_element_type=jnp.float32)
    h = jnp.maximum(h + b1_ref[...], 0.0)
    # lin2 + ReLU
    h = jnp.dot(h.astype(jnp.bfloat16), w2_ref[...],
                preferred_element_type=jnp.float32)
    h = jnp.maximum(h + b2_ref[...], 0.0)
    # lin3 + ReLU
    h = jnp.dot(h.astype(jnp.bfloat16), w3_ref[...],
                preferred_element_type=jnp.float32)
    h = jnp.maximum(h + b3_ref[...], 0.0)
    # lin4 (no activation)
    h = jnp.dot(h.astype(jnp.bfloat16), w4_ref[...],
                preferred_element_type=jnp.float32)
    o_ref[...] = (h + b4_ref[...]).astype(o_ref.dtype)


def _round_up(n, m):
    return ((n + m - 1) // m) * m


def _pad_to(a, shape):
    pads = [(0, s - d) for d, s in zip(a.shape, shape)]
    return jnp.pad(a, pads)


def mlp_forward(x, params, tm=256):
    """x: (B, 784) f32. params: w1..w4 (out,in) f32, b1..b4 (out,) f32."""
    B = x.shape[0]
    # Batch tile: at most `tm` rows per grid step, always a sublane multiple of 8.
    TM = min(tm, _round_up(B, 8))
    B_pad = _round_up(B, TM)

    # --- plain-JAX glue: zero-pad to lane-aligned widths, bf16 for MXU inputs ---
    x_p = _pad_to(x, (B_pad, PAD_IN)).astype(jnp.bfloat16)
    w1 = _pad_to(params["w1"].T, (PAD_IN, PAD_H1)).astype(jnp.bfloat16)
    w2 = _pad_to(params["w2"].T, (PAD_H1, PAD_H2)).astype(jnp.bfloat16)
    w3 = _pad_to(params["w3"].T, (PAD_H2, PAD_H3)).astype(jnp.bfloat16)
    w4 = _pad_to(params["w4"].T, (PAD_H3, PAD_OUT)).astype(jnp.bfloat16)
    b1 = _pad_to(params["b1"].reshape(1, -1), (1, PAD_H1))
    b2 = _pad_to(params["b2"].reshape(1, -1), (1, PAD_H2))
    b3 = _pad_to(params["b3"].reshape(1, -1), (1, PAD_H3))
    b4 = _pad_to(params["b4"].reshape(1, -1), (1, PAD_OUT))

    grid = (B_pad // TM,)
    x_spec = pl.BlockSpec((TM, PAD_IN), lambda i: (i, 0))
    out_spec = pl.BlockSpec((TM, PAD_OUT), lambda i: (i, 0))

    def const_spec(shape):
        # Same block every grid step -> weights/biases stay VMEM-resident.
        return pl.BlockSpec(shape, lambda i: (0, 0))

    out = pl.pallas_call(
        mlp_kernel,
        out_shape=jax.ShapeDtypeStruct((B_pad, PAD_OUT), jnp.float32),
        grid=grid,
        in_specs=[
            x_spec,
            const_spec((PAD_IN, PAD_H1)), const_spec((1, PAD_H1)),
            const_spec((PAD_H1, PAD_H2)), const_spec((1, PAD_H2)),
            const_spec((PAD_H2, PAD_H3)), const_spec((1, PAD_H3)),
            const_spec((PAD_H3, PAD_OUT)), const_spec((1, PAD_OUT)),
        ],
        out_specs=out_spec,
        compiler_params=pltpu.CompilerParams(
            dimension_semantics=("parallel",)),
    )(x_p, w1, b1, w2, b2, w3, b3, w4, b4)

    # Strip batch + lane padding back to the PyTorch-shaped result.
    return out[:B, :10]


def init_params(key):
    """Deterministic init mirroring nn.Linear default (uniform +/-1/sqrt(fan_in))."""
    dims = [(392, 784), (196, 392), (98, 196), (10, 98)]
    params = {}
    keys = jax.random.split(key, 2 * len(dims))
    for i, (out_d, in_d) in enumerate(dims):
        bound = 1.0 / jnp.sqrt(in_d)
        params[f"w{i+1}"] = jax.random.uniform(
            keys[2 * i], (out_d, in_d), jnp.float32, -bound, bound)
        params[f"b{i+1}"] = jax.random.uniform(
            keys[2 * i + 1], (out_d,), jnp.float32, -bound, bound)
    return params


def reference_forward(x, params):
    h = jnp.maximum(x @ params["w1"].T + params["b1"], 0.0)
    h = jnp.maximum(h @ params["w2"].T + params["b2"], 0.0)
    h = jnp.maximum(h @ params["w3"].T + params["b3"], 0.0)
    return h @ params["w4"].T + params["b4"]


if __name__ == "__main__":
    key = jax.random.PRNGKey(0)
    kp, kx = jax.random.split(key)
    params = init_params(kp)

    B = 8  # small batch
    x = jax.random.normal(kx, (B, 784), jnp.float32)

    out = mlp_forward(x, params)
    out = jax.block_until_ready(out)

    ref = reference_forward(x, params)
    assert out.shape == (B, 10), out.shape
    # bf16 inputs/weights (f32 accumulation) -> loosened tolerance vs f32 ref.
    assert jnp.allclose(out, ref, atol=5e-2, rtol=5e-2), "mismatch vs reference"

    print("KERNEL_OK")
</pallas_src>

<mosaic_0001>
module attributes {stable_mosaic.version = 11 : i64} {
  func.func @mlp_kernel(%arg0: i32, %arg1: memref<8x896xbf16, #tpu.memory_space<vmem>>, %arg2: memref<896x512xbf16, #tpu.memory_space<vmem>>, %arg3: memref<1x512xf32, #tpu.memory_space<vmem>>, %arg4: memref<512x256xbf16, #tpu.memory_space<vmem>>, %arg5: memref<1x256xf32, #tpu.memory_space<vmem>>, %arg6: memref<256x128xbf16, #tpu.memory_space<vmem>>, %arg7: memref<1x128xf32, #tpu.memory_space<vmem>>, %arg8: memref<128x128xbf16, #tpu.memory_space<vmem>>, %arg9: memref<1x128xf32, #tpu.memory_space<vmem>>, %arg10: memref<8x128xf32, #tpu.memory_space<vmem>>) attributes {dimension_semantics = [#tpu.dimension_semantics<parallel>], iteration_bounds = array<i64: 1>, scalar_prefetch = 0 : i64, scratch_operands = 0 : i64, tpu.core_type = #tpu.core_type<tc>, window_params = [{transform_indices = @transform_0, window_bounds = array<i64: 8, 896>}, {pipeline_mode = #tpu.pipeline_mode<synchronous>, transform_indices = @transform_1, window_bounds = array<i64: 896, 512>}, {pipeline_mode = #tpu.pipeline_mode<synchronous>, transform_indices = @transform_2, window_bounds = array<i64: 1, 512>}, {pipeline_mode = #tpu.pipeline_mode<synchronous>, transform_indices = @transform_3, window_bounds = array<i64: 512, 256>}, {pipeline_mode = #tpu.pipeline_mode<synchronous>, transform_indices = @transform_4, window_bounds = array<i64: 1, 256>}, {pipeline_mode = #tpu.pipeline_mode<synchronous>, transform_indices = @transform_5, window_bounds = array<i64: 256, 128>}, {pipeline_mode = #tpu.pipeline_mode<synchronous>, transform_indices = @transform_6, window_bounds = array<i64: 1, 128>}, {pipeline_mode = #tpu.pipeline_mode<synchronous>, transform_indices = @transform_7, window_bounds = array<i64: 128, 128>}, {pipeline_mode = #tpu.pipeline_mode<synchronous>, transform_indices = @transform_8, window_bounds = array<i64: 1, 128>}, {transform_indices = @transform_9, window_bounds = array<i64: 8, 128>}]} {
    %c0 = arith.constant 0 : index
    %c0_0 = arith.constant 0 : index
    %0 = vector.load %arg1[%c0, %c0_0] : memref<8x896xbf16, #tpu.memory_space<vmem>>, vector<8x896xbf16>
    %c0_1 = arith.constant 0 : index
    %c0_2 = arith.constant 0 : index
    %1 = vector.load %arg2[%c0_1, %c0_2] : memref<896x512xbf16, #tpu.memory_space<vmem>>, vector<896x512xbf16>
    %cst = arith.constant dense<0.000000e+00> : vector<8x512xf32>
    %2 = tpu.matmul %0, %1, %cst {dimension_numbers = #tpu.dot_dimension_numbers<[1], [0], [0], [1], [0, 0, 1, 1], [], []>} : vector<8x896xbf16>, vector<896x512xbf16>, vector<8x512xf32> -> vector<8x512xf32>
    %c0_3 = arith.constant 0 : index
    %c0_4 = arith.constant 0 : index
    %3 = vector.load %arg3[%c0_3, %c0_4] : memref<1x512xf32, #tpu.memory_space<vmem>>, vector<1x512xf32>
    %4 = vector.broadcast %3 : vector<1x512xf32> to vector<8x512xf32>
    %5 = arith.addf %2, %4 : vector<8x512xf32>
    %cst_5 = arith.constant 0.000000e+00 : f32
    %6 = vector.broadcast %cst_5 : f32 to vector<8x512xf32>
    %7 = arith.maximumf %5, %6 : vector<8x512xf32>
    %8 = arith.truncf %7 : vector<8x512xf32> to vector<8x512xbf16>
    %c0_6 = arith.constant 0 : index
    %c0_7 = arith.constant 0 : index
    %9 = vector.load %arg4[%c0_6, %c0_7] : memref<512x256xbf16, #tpu.memory_space<vmem>>, vector<512x256xbf16>
    %cst_8 = arith.constant dense<0.000000e+00> : vector<8x256xf32>
    %10 = tpu.matmul %8, %9, %cst_8 {dimension_numbers = #tpu.dot_dimension_numbers<[1], [0], [0], [1], [0, 0, 1, 1], [], []>} : vector<8x512xbf16>, vector<512x256xbf16>, vector<8x256xf32> -> vector<8x256xf32>
    %c0_9 = arith.constant 0 : index
    %c0_10 = arith.constant 0 : index
    %11 = vector.load %arg5[%c0_9, %c0_10] : memref<1x256xf32, #tpu.memory_space<vmem>>, vector<1x256xf32>
    %12 = vector.broadcast %11 : vector<1x256xf32> to vector<8x256xf32>
    %13 = arith.addf %10, %12 : vector<8x256xf32>
    %cst_11 = arith.constant 0.000000e+00 : f32
    %14 = vector.broadcast %cst_11 : f32 to vector<8x256xf32>
    %15 = arith.maximumf %13, %14 : vector<8x256xf32>
    %16 = arith.truncf %15 : vector<8x256xf32> to vector<8x256xbf16>
    %c0_12 = arith.constant 0 : index
    %c0_13 = arith.constant 0 : index
    %17 = vector.load %arg6[%c0_12, %c0_13] : memref<256x128xbf16, #tpu.memory_space<vmem>>, vector<256x128xbf16>
    %cst_14 = arith.constant dense<0.000000e+00> : vector<8x128xf32>
    %18 = tpu.matmul %16, %17, %cst_14 {dimension_numbers = #tpu.dot_dimension_numbers<[1], [0], [0], [1], [0, 0, 1, 1], [], []>} : vector<8x256xbf16>, vector<256x128xbf16>, vector<8x128xf32> -> vector<8x128xf32>
    %c0_15 = arith.constant 0 : index
    %c0_16 = arith.constant 0 : index
    %19 = vector.load %arg7[%c0_15, %c0_16] : memref<1x128xf32, #tpu.memory_space<vmem>>, vector<1x128xf32>
    %20 = vector.broadcast %19 : vector<1x128xf32> to vector<8x128xf32>
    %21 = arith.addf %18, %20 : vector<8x128xf32>
    %cst_17 = arith.constant 0.000000e+00 : f32
    %22 = vector.broadcast %cst_17 : f32 to vector<8x128xf32>
    %23 = arith.maximumf %21, %22 : vector<8x128xf32>
    %24 = arith.truncf %23 : vector<8x128xf32> to vector<8x128xbf16>
    %c0_18 = arith.constant 0 : index
    %c0_19 = arith.constant 0 : index
    %25 = vector.load %arg8[%c0_18, %c0_19] : memref<128x128xbf16, #tpu.memory_space<vmem>>, vector<128x128xbf16>
    %cst_20 = arith.constant dense<0.000000e+00> : vector<8x128xf32>
    %26 = tpu.matmul %24, %25, %cst_20 {dimension_numbers = #tpu.dot_dimension_numbers<[1], [0], [0], [1], [0, 0, 1, 1], [], []>} : vector<8x128xbf16>, vector<128x128xbf16>, vector<8x128xf32> -> vector<8x128xf32>
    %c0_21 = arith.constant 0 : index
    %c0_22 = arith.constant 0 : index
    %27 = vector.load %arg9[%c0_21, %c0_22] : memref<1x128xf32, #tpu.memory_space<vmem>>, vector<1x128xf32>
    %28 = vector.broadcast %27 : vector<1x128xf32> to vector<8x128xf32>
    %29 = arith.addf %26, %28 : vector<8x128xf32>
    %c0_23 = arith.constant 0 : index
    %c0_24 = arith.constant 0 : index
    %30 = vector.load %arg10[%c0_23, %c0_24] : memref<8x128xf32, #tpu.memory_space<vmem>>, vector<8x128xf32>
    tpu.vector_store %arg10[%c0_23, %c0_24], %29 {strides = array<i32>} : memref<8x128xf32, #tpu.memory_space<vmem>>, vector<8x128xf32>,
    return
  }
  func.func @transform_0(%arg0: i32) -> (i32, i32) {
    %c0_i32 = arith.constant 0 : i32
    %c0_i32_0 = arith.constant 0 : i32
    return %arg0, %c0_i32 : i32, i32
  }
  func.func @transform_1(%arg0: i32) -> (i32, i32) {
    %c0_i32 = arith.constant 0 : i32
    %c0_i32_0 = arith.constant 0 : i32
    %c0_i32_1 = arith.constant 0 : i32
    return %c0_i32, %c0_i32_0 : i32, i32
  }
  func.func @transform_2(%arg0: i32) -> (i32, i32) {
    %c0_i32 = arith.constant 0 : i32
    %c0_i32_0 = arith.constant 0 : i32
    %c0_i32_1 = arith.constant 0 : i32
    return %c0_i32, %c0_i32_0 : i32, i32
  }
  func.func @transform_3(%arg0: i32) -> (i32, i32) {
    %c0_i32 = arith.constant 0 : i32
    %c0_i32_0 = arith.constant 0 : i32
    %c0_i32_1 = arith.constant 0 : i32
    return %c0_i32, %c0_i32_0 : i32, i32
  }
  func.func @transform_4(%arg0: i32) -> (i32, i32) {
    %c0_i32 = arith.constant 0 : i32
    %c0_i32_0 = arith.constant 0 : i32
    %c0_i32_1 = arith.constant 0 : i32
    return %c0_i32, %c0_i32_0 : i32, i32
  }
  func.func @transform_5(%arg0: i32) -> (i32, i32) {
    %c0_i32 = arith.constant 0 : i32
    %c0_i32_0 = arith.constant 0 : i32
    %c0_i32_1 = arith.constant 0 : i32
    return %c0_i32, %c0_i32_0 : i32, i32
  }
  func.func @transform_6(%arg0: i32) -> (i32, i32) {
    %c0_i32 = arith.constant 0 : i32
    %c0_i32_0 = arith.constant 0 : i32
    %c0_i32_1 = arith.constant 0 : i32
    return %c0_i32, %c0_i32_0 : i32, i32
  }
  func.func @transform_7(%arg0: i32) -> (i32, i32) {
    %c0_i32 = arith.constant 0 : i32
    %c0_i32_0 = arith.constant 0 : i32
    %c0_i32_1 = arith.constant 0 : i32
    return %c0_i32, %c0_i32_0 : i32, i32
  }
  func.func @transform_8(%arg0: i32) -> (i32, i32) {
    %c0_i32 = arith.constant 0 : i32
    %c0_i32_0 = arith.constant 0 : i32
    %c0_i32_1 = arith.constant 0 : i32
    return %c0_i32, %c0_i32_0 : i32, i32
  }
  func.func @transform_9(%arg0: i32) -> (i32, i32) {
    %c0_i32 = arith.constant 0 : i32
    %c0_i32_0 = arith.constant 0 : i32
    return %arg0, %c0_i32 : i32, i32
  }
}

</mosaic_0001>

<bundles_post_ra>
// kernel: tpu_custom_call.1
= control target key start
LH: loop header
LB: loop body
LE: loop exit
PB: predicated region body
PF: predicated region fallthrough
CT: control target
= control target key end

     0   :  { %14 = vsyncpa [#allocation3], 0  ;;  %s3854_s0 = inlined_call_operand.hbm [shape: bf16[8,896], index: 0, kind: input, shape index: {}]   ;;  %s3855_s1 = inlined_call_operand.hbm [shape: bf16[896,512], index: 1, kind: input, shape index: {}]   ;;  %s3856_s2 = inlined_call_operand.vmem [shape: f32[1,512], index: 2, kind: input, shape index: {}]   ;;  %s3857_s3 = inlined_call_operand.hbm [shape: bf16[512,256], index: 3, kind: input, shape index: {}]   ;;  %s3858_s4 = inlined_call_operand.vmem [shape: f32[1,256], index: 4, kind: input, shape index: {}]   ;;  %s3859_s5 = inlined_call_operand.hbm [shape: bf16[256,128], index: 5, kind: input, shape index: {}]   ;;  %s3860_s6 = inlined_call_operand.vmem [shape: f32[1,128], index: 6, kind: input, shape index: {}]   ;;  %s3861_s7 = inlined_call_operand.hbm [shape: bf16[128,128], index: 7, kind: input, shape index: {}]   ;;  %s3862_s8 = inlined_call_operand.vmem [shape: f32[1,128], index: 8, kind: input, shape index: {}]   ;;  %s3863_s9 = inlined_call_operand.hbm [shape: f32[8,128], index: 9, kind: output, shape index: {}]  }
   0x1   :  { %15 = vsyncpa [#allocation6], 0 }
   0x2   :  { %16 = vsyncpa [#allocation9], 0 }
   0x3   :  { %17 = vsyncpa [#allocation4], 0  ;;  %s3642_s30 = smov [#allocation5]   ;;  %s3502_s13 = scalar_lea.hbm %s3855_s1, 28672 }
   0x4   :  { %s33_s10 = sshll.u32 %s3642_s30, 4  ;;  %p3503_p0 = scmp.ne.s32.totalorder %s3855_s1, %s3502_s13  ;;  %s34_s10 = int_to_ptr.vmem [resolvable:$true] %s33_s10 }
   0x5   :  { %p3506_p1 = scmp.lt.u32.totalorder %s3502_s13, %s3855_s1 }
   0x7   :  { %p3508_p2 = pnand %p3506_p1, %p3503_p0 }
   0x9   :  { %3511 = shalt.err (!%p3508_p2)
}
   0xa   :  { %s3512_s18 = scalar_lea.vmem %s34_s10, 28672  ;;  %p3517_p4 = scmp.lt.s32.totalorder %s34_s10, %s34_s10 }
   0xb   :  { %p3513_p3 = scmp.ne.s32.totalorder %s34_s10, %s3512_s18  ;;  %p3518_p5 = scmp.lt.s32.totalorder %s3512_s18, %s3512_s18 }
   0xd   :  { %p3519_p6 = por %p3518_p5, %p3517_p4 }
   0xf   :  { %p3520_p7 = pnand %p3519_p6, %p3513_p3 }
  0x11   :  { %3523 = shalt.err (!%p3520_p7)
}
  0x12   :  { %s3643_s19 = smov 256   ;;  %s3644_s20 = smov 16  }
  0x13   :  { %39 = dma.hbm_to_vmem [thread:$0]  %s3855_s1, 28672, %s34_s10, [#allocation6], %s3643_s19, %s3643_s19, %s3644_s20  }
  0x14   :  { %s3645_s23 = smov [#allocation8]   ;;  %s3524_s27 = scalar_lea.hbm %s3859_s5, 2048 }
  0x15   :  { %s61_s24 = sshll.u32 %s3645_s23, 4  ;;  %p3525_p8 = scmp.ne.s32.totalorder %s3859_s5, %s3524_s27  ;;  %s62_s24 = int_to_ptr.vmem [resolvable:$true] %s61_s24 }
  0x16   :  { %p3528_p9 = scmp.lt.u32.totalorder %s3524_s27, %s3859_s5 }
  0x18   :  { %p3530_p10 = pnand %p3528_p9, %p3525_p8 }
  0x1a   :  { %3533 = shalt.err (!%p3530_p10)
}
  0x1b   :  { %s3534_s12 = scalar_lea.vmem %s62_s24, 2048  ;;  %p3539_p12 = scmp.lt.s32.totalorder %s62_s24, %s62_s24 }
  0x1c   :  { %p3535_p11 = scmp.ne.s32.totalorder %s62_s24, %s3534_s12  ;;  %p3540_p13 = scmp.lt.s32.totalorder %s3534_s12, %s3534_s12 }
  0x1e   :  { %p3541_p0 = por %p3540_p13, %p3539_p12 }
  0x20   :  { %p3542_p1 = pnand %p3541_p0, %p3535_p11 }
  0x22   :  { %3545 = shalt.err (!%p3542_p1)
}
  0x23   :  { %s3646_s1 = smov 64   ;;  %s3647_s10 = smov 4  }
  0x24   :  { %67 = dma.hbm_to_vmem [thread:$0]  %s3859_s5, 2048, %s62_s24, [#allocation9], %s3646_s1, %s3646_s1, %s3647_s10  }
  0x25   :  { %s3648_s15 = smov [#allocation2]   ;;  %s3649_s17 = smov [#allocation7]  }
  0x26   :  { %s24_s16 = sshll.u32 %s3648_s15, 4  ;;  %s47_s18 = sshll.u32 %s3649_s17, 4  ;;  %s25_s16 = int_to_ptr.vmem [resolvable:$true] %s24_s16  ;;  %s3734_s18 = int_to_ptr.vmem [resolvable:$true] %s47_s18 }
  0x27   :  { %s3546_s21 = scalar_lea.hbm %s3854_s0, 448 }
  0x28   :  { %p3547_p2 = scmp.ne.s32.totalorder %s3854_s0, %s3546_s21  ;;  %p3550_p3 = scmp.lt.u32.totalorder %s3546_s21, %s3854_s0 }
  0x2a   :  { %p3552_p4 = pnand %p3550_p3, %p3547_p2 }
  0x2c   :  { %3555 = shalt.err (!%p3552_p4)
}
  0x2d   :  { %s3556_s5 = scalar_lea.vmem %s25_s16, 448  ;;  %p3561_p6 = scmp.lt.s32.totalorder %s25_s16, %s25_s16 }
  0x2e   :  { %p3557_p5 = scmp.ne.s32.totalorder %s25_s16, %s3556_s5  ;;  %p3562_p7 = scmp.lt.s32.totalorder %s3556_s5, %s3556_s5 }
  0x30   :  { %p3563_p8 = por %p3562_p7, %p3561_p6 }
  0x32   :  { %p3564_p9 = pnand %p3563_p8, %p3557_p5 }
  0x34   :  { %3567 = shalt.err (!%p3564_p9)
}
  0x35   :  { %27 = dma.hbm_to_vmem [thread:$0]  %s3854_s0, 448, %s25_s16, [#allocation3]  }
  0x36   :  { %s3568_s30 = scalar_lea.hbm %s3857_s3, 8192 }
  0x37   :  { %p3569_p10 = scmp.ne.s32.totalorder %s3857_s3, %s3568_s30  ;;  %p3572_p11 = scmp.lt.u32.totalorder %s3568_s30, %s3857_s3 }
  0x39   :  { %p3574_p12 = pnand %p3572_p11, %p3569_p10 }
  0x3b   :  { %3577 = shalt.err (!%p3574_p12)
}
  0x3c   :  { %s3578_s15 = scalar_lea.vmem %s3734_s18, 8192  ;;  %p3583_p0 = scmp.lt.s32.totalorder %s3734_s18, %s3734_s18 }
  0x3d   :  { %p3579_p13 = scmp.ne.s32.totalorder %s3734_s18, %s3578_s15  ;;  %p3584_p1 = scmp.lt.s32.totalorder %s3578_s15, %s3578_s15 }
  0x3f   :  { %p3585_p2 = por %p3584_p1, %p3583_p0 }
  0x41   :  { %p3586_p3 = pnand %p3585_p2, %p3579_p13 }
  0x43   :  { %3589 = shalt.err (!%p3586_p3)
}
  0x44   :  { %s3650_s0 = smov 128   ;;  %s3651_s16 = smov 8  }
  0x45   :  { %53 = dma.hbm_to_vmem [thread:$0]  %s3857_s3, 8192, %s3734_s18, [#allocation6], %s3650_s0, %s3650_s0, %s3651_s16  }
  0x46   :  { %s3652_s20 = smov [#allocation10]   ;;  %s3590_s25 = scalar_lea.hbm %s3861_s7, 1024 }
  0x47   :  { %s75_s21 = sshll.u32 %s3652_s20, 4  ;;  %p3591_p4 = scmp.ne.s32.totalorder %s3861_s7, %s3590_s25  ;;  %s76_s21 = int_to_ptr.vmem [resolvable:$true] %s75_s21 }
  0x48   :  { %p3594_p5 = scmp.lt.u32.totalorder %s3590_s25, %s3861_s7 }
  0x4a   :  { %p3596_p6 = pnand %p3594_p5, %p3591_p4 }
  0x4c   :  { %3599 = shalt.err (!%p3596_p6)
}
  0x4d   :  { %s3600_s28 = scalar_lea.vmem %s76_s21, 1024  ;;  %p3605_p8 = scmp.lt.s32.totalorder %s76_s21, %s76_s21 }
  0x4e   :  { %p3601_p7 = scmp.ne.s32.totalorder %s76_s21, %s3600_s28  ;;  %p3606_p9 = scmp.lt.s32.totalorder %s3600_s28, %s3600_s28 }
  0x50   :  { %p3607_p10 = por %p3606_p9, %p3605_p8 }
  0x52   :  { %p3608_p11 = pnand %p3607_p10, %p3601_p7 }
  0x54   :  { %3611 = shalt.err (!%p3608_p11)
}
  0x55   :  { %81 = dma.hbm_to_vmem [thread:$0]  %s3861_s7, 1024, %s76_s21, [#allocation9], %s3646_s1, %s3646_s1, %s3647_s10  }
  0x56   :  { %3634 = dma.done.wait [#allocation3], 448  }
  0x57   :  { %3635 = vsyncadd [#allocation3], 4294966848 }
  0x58   :  { %3636 = dma.done.wait [#allocation6], 36864  }
  0x59   :  { %3637 = vsyncadd [#allocation6], 4294930432 }
  0x5a   :  { %3638 = dma.done.wait [#allocation9], 3072  }
  0x5b   :  { %3639 = vsyncadd [#allocation9], 4294964224  ;;  %v3653_v0 = vmov 0   ;;  %v3038_v1 = vld [vmem:[#allocation5 + $0x4] ss:$16 sps:$4 sm:$0xff]   ;;  %vm3655_vm0 = vmmov 0  }
  0x5c   :  { %1650 = vmatprep.mubr.bf16.mxu1 %v3653_v0  ;;  %v3040_v2 = vld [vmem:[#allocation5 + $0x604] ss:$16 sps:$4 sm:$0xff]   ;;  %1495 = vmatprep.subr.bf16.mxu0 %v3038_v1  ;;  %v3042_v3 = vld [vmem:[#allocation5] ss:$16 sps:$4 sm:$0xff]   ;;  %v3091_v34 = vld [vmem:[#allocation5 + $0xc] ss:$16 sps:$4 sm:$0xff]  }
  0x5d   :  { %v3043_v4 = vld [vmem:[#allocation5 + $0x600] ss:$16 sps:$4 sm:$0xff]   ;;  %1618 = vmatprep.subr.bf16.mxu1 %v3040_v2  ;;  %v3044_v5 = vld [vmem:[#allocation5 + $0x24] ss:$16 sps:$4 sm:$0xff]   ;;  %1496 = vmatpush1.bf16.msra.mxu0 %v3042_v3  ;;  %v3088_v35 = vld [vmem:[#allocation2 + $0x18] ss:$0 sps:$4 sm:$0xff]  }
  0x5e   :  { %1619 = vmatpush1.bf16.msra.mxu1 %v3043_v4  ;;  %v3046_v6 = vld [vmem:[#allocation5 + $0x624] ss:$16 sps:$4 sm:$0xff]   ;;  %v3048_v7 = vld [vmem:[#allocation5 + $0x20] ss:$16 sps:$4 sm:$0xff]   ;;  %1497 = vmatprep.subr.bf16.mxu0 %v3044_v5  ;;  %v3089_v36 = vld [vmem:[#allocation5 + $0x8] ss:$16 sps:$4 sm:$0xff]  }
  0x5f   :  { %v3049_v8 = vld [vmem:[#allocation5 + $0x620] ss:$16 sps:$4 sm:$0xff]   ;;  %1620 = vmatprep.subr.bf16.mxu1 %v3046_v6  ;;  %v3050_v9 = vld [vmem:[#allocation5 + $0x44] ss:$16 sps:$4 sm:$0xff]   ;;  %v3097_v39 = vld [vmem:[#allocation5 + $0x2c] ss:$16 sps:$4 sm:$0xff]  }
  0x60   :  { %v3052_v10 = vld [vmem:[#allocation5 + $0x644] ss:$16 sps:$4 sm:$0xff]   ;;  %v3054_v11 = vld [vmem:[#allocation5 + $0x40] ss:$16 sps:$4 sm:$0xff]   ;;  %v3095_v40 = vld [vmem:[#allocation5 + $0x28] ss:$16 sps:$4 sm:$0xff]  }
  0x61   :  { %v3055_v12 = vld [vmem:[#allocation5 + $0x640] ss:$16 sps:$4 sm:$0xff]   ;;  %1498 = vmatpush1.bf16.msra.mxu0 %v3048_v7  ;;  %v3056_v13 = vld [vmem:[#allocation5 + $0x64] ss:$16 sps:$4 sm:$0xff]   ;;  %v3103_v43 = vld [vmem:[#allocation5 + $0x4c] ss:$16 sps:$4 sm:$0xff]  }
  0x62   :  { %1621 = vmatpush1.bf16.msra.mxu1 %v3049_v8  ;;  %1499 = vmatprep.subr.bf16.mxu0 %v3050_v9  ;;  %v3058_v14 = vld [vmem:[#allocation5 + $0x664] ss:$16 sps:$4 sm:$0xff]   ;;  %v3060_v15 = vld [vmem:[#allocation5 + $0x60] ss:$16 sps:$4 sm:$0xff]   ;;  %v3101_v44 = vld [vmem:[#allocation5 + $0x48] ss:$16 sps:$4 sm:$0xff]  }
  0x63   :  { %1622 = vmatprep.subr.bf16.mxu1 %v3052_v10  ;;  %v3061_v16 = vld [vmem:[#allocation5 + $0x660] ss:$16 sps:$4 sm:$0xff]   ;;  %v3062_v17 = vld [vmem:[#allocation5 + $0x84] ss:$16 sps:$4 sm:$0xff]   ;;  %v3109_v47 = vld [vmem:[#allocation5 + $0x6c] ss:$16 sps:$4 sm:$0xff]  }
  0x64   :  { %v3064_v18 = vld [vmem:[#allocation5 + $0x684] ss:$16 sps:$4 sm:$0xff]   ;;  %v3066_v19 = vld [vmem:[#allocation5 + $0x80] ss:$16 sps:$4 sm:$0xff]   ;;  %v3107_v48 = vld [vmem:[#allocation5 + $0x68] ss:$16 sps:$4 sm:$0xff]  }
  0x65   :  { %1500 = vmatpush1.bf16.msra.mxu0 %v3054_v11  ;;  %v3067_v20 = vld [vmem:[#allocation5 + $0x680] ss:$16 sps:$4 sm:$0xff]   ;;  %v3068_v21 = vld [vmem:[#allocation5 + $0xa4] ss:$16 sps:$4 sm:$0xff]   ;;  %v3115_v53 = vld [vmem:[#allocation5 + $0x8c] ss:$16 sps:$4 sm:$0xff]  }
  0x66   :  { %1623 = vmatpush1.bf16.msra.mxu1 %v3055_v12  ;;  %1501 = vmatprep.subr.bf16.mxu0 %v3056_v13  ;;  %v3070_v22 = vld [vmem:[#allocation5 + $0x6a4] ss:$16 sps:$4 sm:$0xff]   ;;  %v3072_v23 = vld [vmem:[#allocation5 + $0xa0] ss:$16 sps:$4 sm:$0xff]   ;;  %v3113_v54 = vld [vmem:[#allocation5 + $0x88] ss:$16 sps:$4 sm:$0xff]  }
  0x67   :  { %1624 = vmatprep.subr.bf16.mxu1 %v3058_v14  ;;  %v3073_v24 = vld [vmem:[#allocation5 + $0x6a0] ss:$16 sps:$4 sm:$0xff]   ;;  %v3074_v25 = vld [vmem:[#allocation5 + $0xc4] ss:$16 sps:$4 sm:$0xff]   ;;  %v3121_v57 = vld [vmem:[#allocation5 + $0xac] ss:$16 sps:$4 sm:$0xff]  }
  0x68   :  { %v3076_v26 = vld [vmem:[#allocation5 + $0x6c4] ss:$16 sps:$4 sm:$0xff]   ;;  %v3078_v27 = vld [vmem:[#allocation5 + $0xc0] ss:$16 sps:$4 sm:$0xff]   ;;  %v3119_v58 = vld [vmem:[#allocation5 + $0xa8] ss:$16 sps:$4 sm:$0xff]  }
  0x69   :  { %1502 = vmatpush1.bf16.msra.mxu0 %v3060_v15  ;;  %v3079_v28 = vld [vmem:[#allocation5 + $0x6c0] ss:$16 sps:$4 sm:$0xff]   ;;  %v3080_v29 = vld [vmem:[#allocation5 + $0xe4] ss:$16 sps:$4 sm:$0xff]   ;;  %v3127_v61 = vld [vmem:[#allocation5 + $0xcc] ss:$16 sps:$4 sm:$0xff]  }
  0x6a   :  { %1625 = vmatpush1.bf16.msra.mxu1 %v3061_v16  ;;  %1503 = vmatprep.subr.bf16.mxu0 %v3062_v17  ;;  %v3082_v30 = vld [vmem:[#allocation5 + $0x6e4] ss:$16 sps:$4 sm:$0xff]   ;;  %v3084_v31 = vld [vmem:[#allocation5 + $0xe0] ss:$16 sps:$4 sm:$0xff]   ;;  %v3125_v62 = vld [vmem:[#allocation5 + $0xc8] ss:$16 sps:$4 sm:$0xff]  }
  0x6b   :  { %1626 = vmatprep.subr.bf16.mxu1 %v3064_v18  ;;  %v3085_v32 = vld [vmem:[#allocation5 + $0x6e0] ss:$16 sps:$4 sm:$0xff]   ;;  %v3086_v33 = vld [vmem:[#allocation5 + $0x104] ss:$16 sps:$4 sm:$0xff]   ;;  %v3133_v2 = vld [vmem:[#allocation5 + $0xec] ss:$16 sps:$4 sm:$0xff]  }
  0x6c   :  { %v3092_v37 = vld [vmem:[#allocation5 + $0x100] ss:$16 sps:$4 sm:$0xff]   ;;  %v3093_v38 = vld [vmem:[#allocation5 + $0x124] ss:$16 sps:$4 sm:$0xff]   ;;  %v3131_v3 = vld [vmem:[#allocation5 + $0xe8] ss:$16 sps:$4 sm:$0xff]  }
  0x6d   :  { %1504 = vmatpush1.bf16.msra.mxu0 %v3066_v19  ;;  %v3098_v41 = vld [vmem:[#allocation5 + $0x120] ss:$16 sps:$4 sm:$0xff]   ;;  %v3099_v42 = vld [vmem:[#allocation5 + $0x144] ss:$16 sps:$4 sm:$0xff]   ;;  %v3142_v6 = vld [vmem:[#allocation5 + $0x10c] ss:$16 sps:$4 sm:$0xff]  }
  0x6e   :  { %1627 = vmatpush1.bf16.msra.mxu1 %v3067_v20  ;;  %1505 = vmatprep.subr.bf16.mxu0 %v3068_v21  ;;  %v3104_v45 = vld [vmem:[#allocation5 + $0x140] ss:$16 sps:$4 sm:$0xff]   ;;  %v3105_v46 = vld [vmem:[#allocation5 + $0x164] ss:$16 sps:$4 sm:$0xff]   ;;  %v3140_v9 = vld [vmem:[#allocation5 + $0x108] ss:$16 sps:$4 sm:$0xff]  }
  0x6f   :  { %1628 = vmatprep.subr.bf16.mxu1 %v3070_v22  ;;  %v100_v49 = vld [vmem:[#allocation2] sm:$0xff]  ;;  %v3110_v50 = vld [vmem:[#allocation5 + $0x160] ss:$16 sps:$4 sm:$0xff]   ;;  %v3148_v11 = vld [vmem:[#allocation5 + $0x12c] ss:$16 sps:$4 sm:$0xff]   ;;  %s3656_s12 = smov [#allocation11]  }
  0x70   :  { %v3111_v51 = vld [vmem:[#allocation5 + $0x184] ss:$16 sps:$4 sm:$0xff]   ;;  %v2620_v52 = vcombine.high %v100_v49, %v100_v49  ;;  %v3116_v55 = vld [vmem:[#allocation5 + $0x180] ss:$16 sps:$4 sm:$0xff]   ;;  %v3781_v7 = vcombine.low %v100_v49, %v100_v49  ;;  %v3146_v13 = vld [vmem:[#allocation5 + $0x128] ss:$16 sps:$4 sm:$0xff]  }
  0x71   :  { %1506 = vmatpush1.bf16.msra.mxu0 %v3072_v23  ;;  %v3117_v56 = vld [vmem:[#allocation5 + $0x1a4] ss:$16 sps:$4 sm:$0xff]   ;;  %v3122_v59 = vld [vmem:[#allocation5 + $0x1a0] ss:$16 sps:$4 sm:$0xff]   ;;  %v3154_v15 = vld [vmem:[#allocation5 + $0x14c] ss:$16 sps:$4 sm:$0xff]  }
  0x72   :  { %1629 = vmatpush1.bf16.msra.mxu1 %v3073_v24  ;;  %1507 = vmatprep.subr.bf16.mxu0 %v3074_v25  ;;  %v3123_v60 = vld [vmem:[#allocation5 + $0x1c4] ss:$16 sps:$4 sm:$0xff]   ;;  %v3128_v63 = vld [vmem:[#allocation5 + $0x1c0] ss:$16 sps:$4 sm:$0xff]   ;;  %v3152_v17 = vld [vmem:[#allocation5 + $0x148] ss:$16 sps:$4 sm:$0xff]  }
  0x73   :  { %1630 = vmatprep.subr.bf16.mxu1 %v3076_v26  ;;  %1527 = vmatprep.mubr.bf16.mxu0 %v2620_v52  ;;  %v3129_v1 = vld [vmem:[#allocation5 + $0x1e4] ss:$16 sps:$4 sm:$0xff]   ;;  %v3134_v4 = vld [vmem:[#allocation5 + $0x1e0] ss:$16 sps:$4 sm:$0xff]   ;;  %v3160_v19 = vld [vmem:[#allocation5 + $0x16c] ss:$16 sps:$4 sm:$0xff]  }
  0x74   :  { %v3139_v5 = vld [vmem:[#allocation5 + $0x204] ss:$16 sps:$4 sm:$0xff]   ;;  %v3137_v8 = vld [vmem:[#allocation5 + $0x200] ss:$16 sps:$4 sm:$0xff]   ;;  %v3158_v21 = vld [vmem:[#allocation5 + $0x168] ss:$16 sps:$4 sm:$0xff]  }
  0x75   :  { %1508 = vmatpush1.bf16.msra.mxu0 %v3078_v27  ;;  %v3145_v10 = vld [vmem:[#allocation5 + $0x224] ss:$16 sps:$4 sm:$0xff]   ;;  %v3143_v12 = vld [vmem:[#allocation5 + $0x220] ss:$16 sps:$4 sm:$0xff]   ;;  %v3166_v23 = vld [vmem:[#allocation5 + $0x18c] ss:$16 sps:$4 sm:$0xff]  }
  0x76   :  { %1631 = vmatpush1.bf16.msra.mxu1 %v3079_v28  ;;  %1509 = vmatprep.subr.bf16.mxu0 %v3080_v29  ;;  %v3151_v14 = vld [vmem:[#allocation5 + $0x244] ss:$16 sps:$4 sm:$0xff]   ;;  %v3149_v16 = vld [vmem:[#allocation5 + $0x240] ss:$16 sps:$4 sm:$0xff]   ;;  %v3164_v25 = vld [vmem:[#allocation5 + $0x188] ss:$16 sps:$4 sm:$0xff]  }
  0x77   :  { %1632 = vmatprep.subr.bf16.mxu1 %v3082_v30  ;;  %v3157_v18 = vld [vmem:[#allocation5 + $0x264] ss:$16 sps:$4 sm:$0xff]   ;;  %v3155_v20 = vld [vmem:[#allocation5 + $0x260] ss:$16 sps:$4 sm:$0xff]   ;;  %v3172_v27 = vld [vmem:[#allocation5 + $0x1ac] ss:$16 sps:$4 sm:$0xff]  }
  0x78   :  { %v3163_v22 = vld [vmem:[#allocation5 + $0x284] ss:$16 sps:$4 sm:$0xff]   ;;  %v3161_v24 = vld [vmem:[#allocation5 + $0x280] ss:$16 sps:$4 sm:$0xff]   ;;  %v3170_v29 = vld [vmem:[#allocation5 + $0x1a8] ss:$16 sps:$4 sm:$0xff]  }
  0x79   :  { %1510 = vmatpush1.bf16.msra.mxu0 %v3084_v31  ;;  %v3169_v26 = vld [vmem:[#allocation5 + $0x2a4] ss:$16 sps:$4 sm:$0xff]   ;;  %v3167_v28 = vld [vmem:[#allocation5 + $0x2a0] ss:$16 sps:$4 sm:$0xff]   ;;  %v3178_v31 = vld [vmem:[#allocation5 + $0x1cc] ss:$16 sps:$4 sm:$0xff]  }
  0x7a   :  { %1633 = vmatpush1.bf16.msra.mxu1 %v3085_v32  ;;  %1511 = vmatprep.subr.bf16.mxu0 %v3086_v33  ;;  %v3175_v30 = vld [vmem:[#allocation5 + $0x2c4] ss:$16 sps:$4 sm:$0xff]   ;;  %v3784_v32 = vld [vmem:[#allocation2 + $0x8] sm:$0xff]  ;;  %s2608_s13 = sshll.u32 %s3656_s12, 4  ;;  %s2609_s13 = int_to_ptr.vmem [resolvable:$true] %s2608_s13 }
  0x7b   :  { %1659 = vmatprep.subr.bf16.mxu1 %v3091_v34  ;;  %v3173_v33 = vld [vmem:[#allocation5 + $0x2c0] ss:$16 sps:$4 sm:$0xff]   ;;  %v3176_v34 = vld [vmem:[#allocation5 + $0x1c8] ss:$16 sps:$4 sm:$0xff]   ;;  %v3202_v49 = vld [vmem:[#allocation5 + $0x24c] ss:$16 sps:$4 sm:$0xff]   ;;  %p3617_p13 = scmp.lt.s32.totalorder %s2609_s13, %s2609_s13 }
  0x7d   :  { %1651 = vmatmul.mubr.bf16.vlgmr.msra.gmra.mrb[0].mxu1 %v3088_v35  ;;  %1512 = vmatpush1.bf16.msra.mxu0 %v3092_v37  ;;  %v2622_v35 = vcombine.high %v3784_v32, %v3784_v32  ;;  %v3184_v37 = vld [vmem:[#allocation5 + $0x1ec] ss:$16 sps:$4 sm:$0xff]  }
  0x7e   :  { %1660 = vmatpush1.bf16.msra.mxu1 %v3089_v36  ;;  %1513 = vmatprep.subr.bf16.mxu0 %v3093_v38  ;;  %v3181_v36 = vld [vmem:[#allocation5 + $0x2e4] ss:$16 sps:$4 sm:$0xff]   ;;  %v3179_v38 = vld [vmem:[#allocation5 + $0x2e0] ss:$16 sps:$4 sm:$0xff]  }
  0x7f   :  { %1661 = vmatprep.subr.bf16.mxu1 %v3097_v39  ;;  %1691 = vmatprep.mubr.bf16.mxu1 %v2620_v52  ;;  %v3182_v39 = vld [vmem:[#allocation5 + $0x1e8] ss:$16 sps:$4 sm:$0xff]   ;;  %v3205_v52 = vld [vmem:[#allocation5 + $0x364] ss:$16 sps:$4 sm:$0xff]  }
  0x81   :  { %1514 = vmatpush1.bf16.msra.mxu0 %v3098_v41  ;;  %v3190_v41 = vld [vmem:[#allocation5 + $0x20c] ss:$16 sps:$4 sm:$0xff]  }
  0x82   :  { %1662 = vmatpush1.bf16.msra.mxu1 %v3095_v40  ;;  %1515 = vmatprep.subr.bf16.mxu0 %v3099_v42  ;;  %v3187_v40 = vld [vmem:[#allocation5 + $0x304] ss:$16 sps:$4 sm:$0xff]   ;;  %v3185_v42 = vld [vmem:[#allocation5 + $0x300] ss:$16 sps:$4 sm:$0xff]  }
  0x83   :  { %1663 = vmatprep.subr.bf16.mxu1 %v3103_v43  ;;  %v3188_v43 = vld [vmem:[#allocation5 + $0x208] ss:$16 sps:$4 sm:$0xff]  }
  0x85   :  { %1516 = vmatpush1.bf16.msra.mxu0 %v3104_v45  ;;  %v3196_v45 = vld [vmem:[#allocation5 + $0x22c] ss:$16 sps:$4 sm:$0xff]  }
  0x86   :  { %1664 = vmatpush1.bf16.msra.mxu1 %v3101_v44  ;;  %1517 = vmatprep.subr.bf16.mxu0 %v3105_v46  ;;  %v3193_v44 = vld [vmem:[#allocation5 + $0x324] ss:$16 sps:$4 sm:$0xff]   ;;  %v3191_v46 = vld [vmem:[#allocation5 + $0x320] ss:$16 sps:$4 sm:$0xff]  }
  0x87   :  { %1665 = vmatprep.subr.bf16.mxu1 %v3109_v47  ;;  %v3194_v47 = vld [vmem:[#allocation5 + $0x228] ss:$16 sps:$4 sm:$0xff]  }
  0x89   :  { %1518 = vmatpush1.bf16.msra.mxu0 %v3110_v50  ;;  %v3197_v50 = vld [vmem:[#allocation5 + $0x340] ss:$16 sps:$4 sm:$0xff]  }
  0x8a   :  { %1666 = vmatpush1.bf16.msra.mxu1 %v3107_v48  ;;  %1519 = vmatprep.subr.bf16.mxu0 %v3111_v51  ;;  %v3199_v48 = vld [vmem:[#allocation5 + $0x344] ss:$16 sps:$4 sm:$0xff]   ;;  %v3200_v51 = vld [vmem:[#allocation5 + $0x248] ss:$16 sps:$4 sm:$0xff]  }
  0x8b   :  { %1667 = vmatprep.subr.bf16.mxu1 %v3115_v53  ;;  %v3208_v53 = vld [vmem:[#allocation5 + $0x26c] ss:$16 sps:$4 sm:$0xff]  }
  0x8d   :  { %1520 = vmatpush1.bf16.msra.mxu0 %v3116_v55  ;;  %v3206_v55 = vld [vmem:[#allocation5 + $0x268] ss:$16 sps:$4 sm:$0xff]  }
  0x8e   :  { %1668 = vmatpush1.bf16.msra.mxu1 %v3113_v54  ;;  %1521 = vmatprep.subr.bf16.mxu0 %v3117_v56  ;;  %v3203_v54 = vld [vmem:[#allocation5 + $0x360] ss:$16 sps:$4 sm:$0xff]   ;;  %v3211_v56 = vld [vmem:[#allocation5 + $0x384] ss:$16 sps:$4 sm:$0xff]  }
  0x8f   :  { %1669 = vmatprep.subr.bf16.mxu1 %v3121_v57  ;;  %v3214_v57 = vld [vmem:[#allocation5 + $0x28c] ss:$16 sps:$4 sm:$0xff]  }
  0x91   :  { %1522 = vmatpush1.bf16.msra.mxu0 %v3122_v59  ;;  %v3212_v59 = vld [vmem:[#allocation5 + $0x288] ss:$16 sps:$4 sm:$0xff]  }
  0x92   :  { %1670 = vmatpush1.bf16.msra.mxu1 %v3119_v58  ;;  %1523 = vmatprep.subr.bf16.mxu0 %v3123_v60  ;;  %v3209_v58 = vld [vmem:[#allocation5 + $0x380] ss:$16 sps:$4 sm:$0xff]   ;;  %v3217_v60 = vld [vmem:[#allocation5 + $0x3a4] ss:$16 sps:$4 sm:$0xff]  }
  0x93   :  { %1671 = vmatprep.subr.bf16.mxu1 %v3127_v61  ;;  %v3220_v61 = vld [vmem:[#allocation5 + $0x2ac] ss:$16 sps:$4 sm:$0xff]  }
  0x95   :  { %1524 = vmatpush1.bf16.msra.mxu0 %v3128_v63  ;;  %v3218_v63 = vld [vmem:[#allocation5 + $0x2a8] ss:$16 sps:$4 sm:$0xff]  }
  0x96   :  { %1672 = vmatpush1.bf16.msra.mxu1 %v3125_v62  ;;  %1525 = vmatprep.subr.bf16.mxu0 %v3129_v1  ;;  %v3215_v62 = vld [vmem:[#allocation5 + $0x3a0] ss:$16 sps:$4 sm:$0xff]   ;;  %v3223_v1 = vld [vmem:[#allocation5 + $0x3c4] ss:$16 sps:$4 sm:$0xff]  }
  0x97   :  { %1673 = vmatprep.subr.bf16.mxu1 %v3133_v2  ;;  %v3226_v2 = vld [vmem:[#allocation5 + $0x2cc] ss:$16 sps:$4 sm:$0xff]  }
  0x99   :  { %1526 = vmatpush1.bf16.msra.mxu0 %v3134_v4  ;;  %v3224_v4 = vld [vmem:[#allocation5 + $0x2c8] ss:$16 sps:$4 sm:$0xff]  }
  0x9a   :  { %1674 = vmatpush1.bf16.msra.mxu1 %v3131_v3  ;;  %1536 = vmatprep.subr.bf16.mxu0 %v3139_v5  ;;  %v3221_v3 = vld [vmem:[#allocation5 + $0x3c0] ss:$16 sps:$4 sm:$0xff]   ;;  %v3229_v5 = vld [vmem:[#allocation5 + $0x3e4] ss:$16 sps:$4 sm:$0xff]  }
  0x9b   :  { %1675 = vmatprep.subr.bf16.mxu1 %v3142_v6  ;;  %v3232_v6 = vld [vmem:[#allocation5 + $0x2ec] ss:$16 sps:$4 sm:$0xff]  }
  0x9c   :  { %1528 = vmatmul.mubr.bf16.vlgmr.msra.gmra.mrb[0].mxu0 %v3781_v7 }
  0x9d   :  { %1537 = vmatpush1.bf16.msra.mxu0 %v3137_v8  ;;  %1568 = vmatprep.mubr.bf16.mxu0 %v2622_v35  ;;  %v3230_v8 = vld [vmem:[#allocation5 + $0x2e8] ss:$16 sps:$4 sm:$0xff]  }
  0x9e   :  { %1676 = vmatpush1.bf16.msra.mxu1 %v3140_v9  ;;  %1538 = vmatprep.subr.bf16.mxu0 %v3145_v10  ;;  %v3237_v9 = vld [vmem:[#allocation5 + $0x404] ss:$16 sps:$4 sm:$0xff]   ;;  %v3240_v10 = vld [vmem:[#allocation5 + $0x30c] ss:$16 sps:$4 sm:$0xff]  }
  0x9f   :  { %1677 = vmatprep.subr.bf16.mxu1 %v3148_v11  ;;  %v3791_v11 = vcombine.low %v3784_v32, %v3784_v32  ;;  %v3267_v32 = vld [vmem:[#allocation5 + $0x4a4] ss:$16 sps:$4 sm:$0xff]  }
  0xa1   :  { %1539 = vmatpush1.bf16.msra.mxu0 %v3143_v12  ;;  %v3235_v12 = vld [vmem:[#allocation5 + $0x400] ss:$16 sps:$4 sm:$0xff]  }
  0xa2   :  { %1678 = vmatpush1.bf16.msra.mxu1 %v3146_v13  ;;  %1540 = vmatprep.subr.bf16.mxu0 %v3151_v14  ;;  %v3238_v13 = vld [vmem:[#allocation5 + $0x308] ss:$16 sps:$4 sm:$0xff]   ;;  %v3243_v14 = vld [vmem:[#allocation5 + $0x424] ss:$16 sps:$4 sm:$0xff]  }
  0xa3   :  { %1679 = vmatprep.subr.bf16.mxu1 %v3154_v15  ;;  %v3246_v15 = vld [vmem:[#allocation5 + $0x32c] ss:$16 sps:$4 sm:$0xff]  }
  0xa5   :  { %1541 = vmatpush1.bf16.msra.mxu0 %v3149_v16  ;;  %v3793_v16 = vld [vmem:[#allocation2 + $0x10] sm:$0xff] }
  0xa6   :  { %1680 = vmatpush1.bf16.msra.mxu1 %v3152_v17  ;;  %1542 = vmatprep.subr.bf16.mxu0 %v3157_v18  ;;  %v3797_v17 = vcombine.high %v3793_v16, %v3793_v16  ;;  %v3241_v18 = vld [vmem:[#allocation5 + $0x420] ss:$16 sps:$4 sm:$0xff]  }
  0xa7   :  { %1681 = vmatprep.subr.bf16.mxu1 %v3160_v19  ;;  %v3244_v19 = vld [vmem:[#allocation5 + $0x328] ss:$16 sps:$4 sm:$0xff]  }
  0xa9   :  { %1543 = vmatpush1.bf16.msra.mxu0 %v3155_v20  ;;  %v3249_v20 = vld [vmem:[#allocation5 + $0x444] ss:$16 sps:$4 sm:$0xff]  }
  0xaa   :  { %1682 = vmatpush1.bf16.msra.mxu1 %v3158_v21  ;;  %1544 = vmatprep.subr.bf16.mxu0 %v3163_v22  ;;  %v3252_v21 = vld [vmem:[#allocation5 + $0x34c] ss:$16 sps:$4 sm:$0xff]   ;;  %v3247_v22 = vld [vmem:[#allocation5 + $0x440] ss:$16 sps:$4 sm:$0xff]  }
  0xab   :  { %1683 = vmatprep.subr.bf16.mxu1 %v3166_v23  ;;  %v3250_v23 = vld [vmem:[#allocation5 + $0x348] ss:$16 sps:$4 sm:$0xff]  }
  0xad   :  { %1545 = vmatpush1.bf16.msra.mxu0 %v3161_v24  ;;  %v3255_v24 = vld [vmem:[#allocation5 + $0x464] ss:$16 sps:$4 sm:$0xff]  }
  0xae   :  { %1684 = vmatpush1.bf16.msra.mxu1 %v3164_v25  ;;  %1546 = vmatprep.subr.bf16.mxu0 %v3169_v26  ;;  %v3258_v25 = vld [vmem:[#allocation5 + $0x36c] ss:$16 sps:$4 sm:$0xff]   ;;  %v3253_v26 = vld [vmem:[#allocation5 + $0x460] ss:$16 sps:$4 sm:$0xff]  }
  0xaf   :  { %1685 = vmatprep.subr.bf16.mxu1 %v3172_v27  ;;  %v3256_v27 = vld [vmem:[#allocation5 + $0x368] ss:$16 sps:$4 sm:$0xff]  }
  0xb1   :  { %1547 = vmatpush1.bf16.msra.mxu0 %v3167_v28  ;;  %v3261_v28 = vld [vmem:[#allocation5 + $0x484] ss:$16 sps:$4 sm:$0xff]  }
  0xb2   :  { %1686 = vmatpush1.bf16.msra.mxu1 %v3170_v29  ;;  %1548 = vmatprep.subr.bf16.mxu0 %v3175_v30  ;;  %v3264_v29 = vld [vmem:[#allocation5 + $0x38c] ss:$16 sps:$4 sm:$0xff]   ;;  %v3259_v30 = vld [vmem:[#allocation5 + $0x480] ss:$16 sps:$4 sm:$0xff]  }
  0xb3   :  { %1687 = vmatprep.subr.bf16.mxu1 %v3178_v31  ;;  %v3262_v31 = vld [vmem:[#allocation5 + $0x388] ss:$16 sps:$4 sm:$0xff]  }
  0xb5   :  { %1549 = vmatpush1.bf16.msra.mxu0 %v3173_v33  ;;  %v3270_v33 = vld [vmem:[#allocation5 + $0x3ac] ss:$16 sps:$4 sm:$0xff]  }
  0xb6   :  { %1688 = vmatpush1.bf16.msra.mxu1 %v3176_v34  ;;  %1550 = vmatprep.subr.bf16.mxu0 %v3181_v36  ;;  %v3265_v34 = vld [vmem:[#allocation5 + $0x4a0] ss:$16 sps:$4 sm:$0xff]   ;;  %v3273_v36 = vld [vmem:[#allocation5 + $0x4c4] ss:$16 sps:$4 sm:$0xff]  }
  0xb7   :  { %1689 = vmatprep.subr.bf16.mxu1 %v3184_v37  ;;  %v3276_v37 = vld [vmem:[#allocation5 + $0x3cc] ss:$16 sps:$4 sm:$0xff]  }
  0xb9   :  { %1551 = vmatpush1.bf16.msra.mxu0 %v3179_v38  ;;  %v3271_v38 = vld [vmem:[#allocation5 + $0x4c0] ss:$16 sps:$4 sm:$0xff]  }
  0xba   :  { %1690 = vmatpush1.bf16.msra.mxu1 %v3182_v39  ;;  %1552 = vmatprep.subr.bf16.mxu0 %v3187_v40  ;;  %v3274_v39 = vld [vmem:[#allocation5 + $0x3c8] ss:$16 sps:$4 sm:$0xff]   ;;  %v3279_v40 = vld [vmem:[#allocation5 + $0x4e4] ss:$16 sps:$4 sm:$0xff]  }
  0xbb   :  { %1700 = vmatprep.subr.bf16.mxu1 %v3190_v41  ;;  %v3282_v41 = vld [vmem:[#allocation5 + $0x3ec] ss:$16 sps:$4 sm:$0xff]  }
  0xbd   :  { %1692 = vmatmul.mubr.bf16.vlgmr.msra.gmra.mrb[4].mxu1 %v3781_v7  ;;  %1553 = vmatpush1.bf16.msra.mxu0 %v3185_v42  ;;  %v3227_v7 = vld [vmem:[#allocation5 + $0x3e0] ss:$16 sps:$4 sm:$0xff]  }
  0xbe   :  { %1701 = vmatpush1.bf16.msra.mxu1 %v3188_v43  ;;  %1554 = vmatprep.subr.bf16.mxu0 %v3193_v44  ;;  %v3277_v42 = vld [vmem:[#allocation5 + $0x4e0] ss:$16 sps:$4 sm:$0xff]   ;;  %v3280_v43 = vld [vmem:[#allocation5 + $0x3e8] ss:$16 sps:$4 sm:$0xff]   ;;  %v3285_v44 = vld [vmem:[#allocation5 + $0x504] ss:$16 sps:$4 sm:$0xff]  }
  0xbf   :  { %1702 = vmatprep.subr.bf16.mxu1 %v3196_v45  ;;  %1732 = vmatprep.mubr.bf16.mxu1 %v2622_v35  ;;  %v3268_v35 = vld [vmem:[#allocation5 + $0x3a8] ss:$16 sps:$4 sm:$0xff]   ;;  %v3288_v45 = vld [vmem:[#allocation5 + $0x40c] ss:$16 sps:$4 sm:$0xff]  }
  0xc1   :  { %1555 = vmatpush1.bf16.msra.mxu0 %v3191_v46  ;;  %v3283_v46 = vld [vmem:[#allocation5 + $0x500] ss:$16 sps:$4 sm:$0xff]  }
  0xc2   :  { %1703 = vmatpush1.bf16.msra.mxu1 %v3194_v47  ;;  %1556 = vmatprep.subr.bf16.mxu0 %v3199_v48  ;;  %v3286_v47 = vld [vmem:[#allocation5 + $0x408] ss:$16 sps:$4 sm:$0xff]   ;;  %v3291_v48 = vld [vmem:[#allocation5 + $0x524] ss:$16 sps:$4 sm:$0xff]  }
  0xc3   :  { %1704 = vmatprep.subr.bf16.mxu1 %v3202_v49  ;;  %v3294_v49 = vld [vmem:[#allocation5 + $0x42c] ss:$16 sps:$4 sm:$0xff]  }
  0xc5   :  { %1557 = vmatpush1.bf16.msra.mxu0 %v3197_v50  ;;  %v3289_v50 = vld [vmem:[#allocation5 + $0x520] ss:$16 sps:$4 sm:$0xff]  }
  0xc6   :  { %1705 = vmatpush1.bf16.msra.mxu1 %v3200_v51  ;;  %1558 = vmatprep.subr.bf16.mxu0 %v3205_v52  ;;  %v3292_v51 = vld [vmem:[#allocation5 + $0x428] ss:$16 sps:$4 sm:$0xff]   ;;  %v3297_v52 = vld [vmem:[#allocation5 + $0x544] ss:$16 sps:$4 sm:$0xff]  }
  0xc7   :  { %1706 = vmatprep.subr.bf16.mxu1 %v3208_v53  ;;  %v3300_v53 = vld [vmem:[#allocation5 + $0x44c] ss:$16 sps:$4 sm:$0xff]  }
  0xc9   :  { %1559 = vmatpush1.bf16.msra.mxu0 %v3203_v54  ;;  %v3295_v54 = vld [vmem:[#allocation5 + $0x540] ss:$16 sps:$4 sm:$0xff]  }
  0xca   :  { %1707 = vmatpush1.bf16.msra.mxu1 %v3206_v55  ;;  %1560 = vmatprep.subr.bf16.mxu0 %v3211_v56  ;;  %v3298_v55 = vld [vmem:[#allocation5 + $0x448] ss:$16 sps:$4 sm:$0xff]   ;;  %v3303_v56 = vld [vmem:[#allocation5 + $0x564] ss:$16 sps:$4 sm:$0xff]  }
  0xcb   :  { %1708 = vmatprep.subr.bf16.mxu1 %v3214_v57  ;;  %v3306_v57 = vld [vmem:[#allocation5 + $0x46c] ss:$16 sps:$4 sm:$0xff]  }
  0xcd   :  { %1561 = vmatpush1.bf16.msra.mxu0 %v3209_v58  ;;  %v3301_v58 = vld [vmem:[#allocation5 + $0x560] ss:$16 sps:$4 sm:$0xff]  }
  0xce   :  { %1709 = vmatpush1.bf16.msra.mxu1 %v3212_v59  ;;  %1562 = vmatprep.subr.bf16.mxu0 %v3217_v60  ;;  %v3304_v59 = vld [vmem:[#allocation5 + $0x468] ss:$16 sps:$4 sm:$0xff]   ;;  %v3309_v60 = vld [vmem:[#allocation5 + $0x584] ss:$16 sps:$4 sm:$0xff]  }
  0xcf   :  { %1710 = vmatprep.subr.bf16.mxu1 %v3220_v61  ;;  %v3312_v61 = vld [vmem:[#allocation5 + $0x48c] ss:$16 sps:$4 sm:$0xff]  }
  0xd1   :  { %1563 = vmatpush1.bf16.msra.mxu0 %v3215_v62  ;;  %v3307_v62 = vld [vmem:[#allocation5 + $0x580] ss:$16 sps:$4 sm:$0xff]  }
  0xd2   :  { %1711 = vmatpush1.bf16.msra.mxu1 %v3218_v63  ;;  %1564 = vmatprep.subr.bf16.mxu0 %v3223_v1  ;;  %v3310_v63 = vld [vmem:[#allocation5 + $0x488] ss:$16 sps:$4 sm:$0xff]   ;;  %v3315_v1 = vld [vmem:[#allocation5 + $0x5a4] ss:$16 sps:$4 sm:$0xff]  }
  0xd3   :  { %1712 = vmatprep.subr.bf16.mxu1 %v3226_v2  ;;  %v3318_v2 = vld [vmem:[#allocation5 + $0x4ac] ss:$16 sps:$4 sm:$0xff]  }
  0xd5   :  { %1565 = vmatpush1.bf16.msra.mxu0 %v3221_v3  ;;  %v3313_v3 = vld [vmem:[#allocation5 + $0x5a0] ss:$16 sps:$4 sm:$0xff]  }
  0xd6   :  { %1713 = vmatpush1.bf16.msra.mxu1 %v3224_v4  ;;  %1566 = vmatprep.subr.bf16.mxu0 %v3229_v5  ;;  %v3316_v4 = vld [vmem:[#allocation5 + $0x4a8] ss:$16 sps:$4 sm:$0xff]   ;;  %v3321_v5 = vld [vmem:[#allocation5 + $0x5c4] ss:$16 sps:$4 sm:$0xff]  }
  0xd7   :  { %1714 = vmatprep.subr.bf16.mxu1 %v3232_v6  ;;  %v3324_v6 = vld [vmem:[#allocation5 + $0x4cc] ss:$16 sps:$4 sm:$0xff]  }
  0xd9   :  { %1567 = vmatpush1.bf16.msra.mxu0 %v3227_v7  ;;  %v3319_v7 = vld [vmem:[#allocation5 + $0x5c0] ss:$16 sps:$4 sm:$0xff]  }
  0xda   :  { %1715 = vmatpush1.bf16.msra.mxu1 %v3230_v8  ;;  %1577 = vmatprep.subr.bf16.mxu0 %v3237_v9  ;;  %v3322_v8 = vld [vmem:[#allocation5 + $0x4c8] ss:$16 sps:$4 sm:$0xff]   ;;  %v3327_v9 = vld [vmem:[#allocation5 + $0x5e4] ss:$16 sps:$4 sm:$0xff]  }
  0xdb   :  { %1716 = vmatprep.subr.bf16.mxu1 %v3240_v10  ;;  %v3330_v10 = vld [vmem:[#allocation5 + $0x4ec] ss:$16 sps:$4 sm:$0xff]  }
  0xdc   :  { %1569 = vmatmul.mubr.bf16.vlgmr.msra.gmra.mrb[0].mxu0 %v3791_v11 }
  0xdd   :  { %1578 = vmatpush1.bf16.msra.mxu0 %v3235_v12  ;;  %1609 = vmatprep.mubr.bf16.mxu0 %v3797_v17  ;;  %v3328_v12 = vld [vmem:[#allocation5 + $0x4e8] ss:$16 sps:$4 sm:$0xff]  }
  0xde   :  { %1717 = vmatpush1.bf16.msra.mxu1 %v3238_v13  ;;  %1579 = vmatprep.subr.bf16.mxu0 %v3243_v14  ;;  %v3335_v13 = vld [vmem:[#allocation5 + $0x50c] ss:$16 sps:$4 sm:$0xff]  }
  0xdf   :  { %1718 = vmatprep.subr.bf16.mxu1 %v3246_v15  ;;  %v3383_v14 = vld [vmem:[#allocation7 + $0x4] ss:$8 sps:$4 sm:$0xff]   ;;  %v3333_v15 = vld [vmem:[#allocation5 + $0x508] ss:$16 sps:$4 sm:$0xff]  }
  0xe1   :  { %1580 = vmatpush1.bf16.msra.mxu0 %v3241_v18  ;;  %v3805_v18 = vcombine.low %v3793_v16, %v3793_v16  ;;  %v3387_v16 = vld [vmem:[#allocation7 + $0x20] ss:$8 sps:$4 sm:$0xff]  }
  0xe2   :  { %1719 = vmatpush1.bf16.msra.mxu1 %v3244_v19  ;;  %1581 = vmatprep.subr.bf16.mxu0 %v3249_v20  ;;  %v3338_v19 = vld [vmem:[#allocation5 + $0x52c] ss:$16 sps:$4 sm:$0xff]  }
  0xe3   :  { %1720 = vmatprep.subr.bf16.mxu1 %v3252_v21  ;;  %v3386_v20 = vld [vmem:[#allocation7 + $0x14] ss:$8 sps:$4 sm:$0xff]   ;;  %v3336_v21 = vld [vmem:[#allocation5 + $0x528] ss:$16 sps:$4 sm:$0xff]  }
  0xe5   :  { %1582 = vmatpush1.bf16.msra.mxu0 %v3247_v22  ;;  %v3384_v22 = vld [vmem:[#allocation7 + $0x10] ss:$8 sps:$4 sm:$0xff]  }
  0xe6   :  { %1721 = vmatpush1.bf16.msra.mxu1 %v3250_v23  ;;  %1583 = vmatprep.subr.bf16.mxu0 %v3255_v24  ;;  %v3341_v23 = vld [vmem:[#allocation5 + $0x54c] ss:$16 sps:$4 sm:$0xff]  }
  0xe7   :  { %1722 = vmatprep.subr.bf16.mxu1 %v3258_v25  ;;  %v3389_v24 = vld [vmem:[#allocation7 + $0x24] ss:$8 sps:$4 sm:$0xff]   ;;  %v3339_v25 = vld [vmem:[#allocation5 + $0x548] ss:$16 sps:$4 sm:$0xff]  }
  0xe9   :  { %1584 = vmatpush1.bf16.msra.mxu0 %v3253_v26  ;;  %v3344_v26 = vld [vmem:[#allocation5 + $0x56c] ss:$16 sps:$4 sm:$0xff]  }
  0xea   :  { %1723 = vmatpush1.bf16.msra.mxu1 %v3256_v27  ;;  %1585 = vmatprep.subr.bf16.mxu0 %v3261_v28  ;;  %v3392_v27 = vld [vmem:[#allocation7 + $0x34] ss:$8 sps:$4 sm:$0xff]   ;;  %v3342_v28 = vld [vmem:[#allocation5 + $0x568] ss:$16 sps:$4 sm:$0xff]  }
  0xeb   :  { %1724 = vmatprep.subr.bf16.mxu1 %v3264_v29  ;;  %v3390_v29 = vld [vmem:[#allocation7 + $0x30] ss:$8 sps:$4 sm:$0xff]  }
  0xed   :  { %1586 = vmatpush1.bf16.msra.mxu0 %v3259_v30  ;;  %v3347_v30 = vld [vmem:[#allocation5 + $0x58c] ss:$16 sps:$4 sm:$0xff]  }
  0xee   :  { %1725 = vmatpush1.bf16.msra.mxu1 %v3262_v31  ;;  %1587 = vmatprep.subr.bf16.mxu0 %v3267_v32  ;;  %v3395_v31 = vld [vmem:[#allocation7 + $0x44] ss:$8 sps:$4 sm:$0xff]   ;;  %v3345_v32 = vld [vmem:[#allocation5 + $0x588] ss:$16 sps:$4 sm:$0xff]  }
  0xef   :  { %1726 = vmatprep.subr.bf16.mxu1 %v3270_v33  ;;  %v3393_v33 = vld [vmem:[#allocation7 + $0x40] ss:$8 sps:$4 sm:$0xff]  }
  0xf1   :  { %1588 = vmatpush1.bf16.msra.mxu0 %v3265_v34  ;;  %v3350_v34 = vld [vmem:[#allocation5 + $0x5ac] ss:$16 sps:$4 sm:$0xff]  }
  0xf2   :  { %1727 = vmatpush1.bf16.msra.mxu1 %v3268_v35  ;;  %1589 = vmatprep.subr.bf16.mxu0 %v3273_v36  ;;  %v3398_v35 = vld [vmem:[#allocation7 + $0x54] ss:$8 sps:$4 sm:$0xff]   ;;  %v3348_v36 = vld [vmem:[#allocation5 + $0x5a8] ss:$16 sps:$4 sm:$0xff]  }
  0xf3   :  { %1728 = vmatprep.subr.bf16.mxu1 %v3276_v37  ;;  %v3396_v37 = vld [vmem:[#allocation7 + $0x50] ss:$8 sps:$4 sm:$0xff]  }
  0xf5   :  { %1590 = vmatpush1.bf16.msra.mxu0 %v3271_v38  ;;  %v3353_v38 = vld [vmem:[#allocation5 + $0x5cc] ss:$16 sps:$4 sm:$0xff]  }
  0xf6   :  { %1729 = vmatpush1.bf16.msra.mxu1 %v3274_v39  ;;  %1591 = vmatprep.subr.bf16.mxu0 %v3279_v40  ;;  %v3401_v39 = vld [vmem:[#allocation7 + $0x64] ss:$8 sps:$4 sm:$0xff]   ;;  %v3351_v40 = vld [vmem:[#allocation5 + $0x5c8] ss:$16 sps:$4 sm:$0xff]  }
  0xf7   :  { %1730 = vmatprep.subr.bf16.mxu1 %v3282_v41  ;;  %v3399_v41 = vld [vmem:[#allocation7 + $0x60] ss:$8 sps:$4 sm:$0xff]  }
  0xf9   :  { %1592 = vmatpush1.bf16.msra.mxu0 %v3277_v42  ;;  %v3356_v42 = vld [vmem:[#allocation5 + $0x5ec] ss:$16 sps:$4 sm:$0xff]  }
  0xfa   :  { %1731 = vmatpush1.bf16.msra.mxu1 %v3280_v43  ;;  %1593 = vmatprep.subr.bf16.mxu0 %v3285_v44  ;;  %v3404_v43 = vld [vmem:[#allocation7 + $0x74] ss:$8 sps:$4 sm:$0xff]   ;;  %v3354_v44 = vld [vmem:[#allocation5 + $0x5e8] ss:$16 sps:$4 sm:$0xff]  }
  0xfb   :  { %1741 = vmatprep.subr.bf16.mxu1 %v3288_v45  ;;  %v3402_v45 = vld [vmem:[#allocation7 + $0x70] ss:$8 sps:$4 sm:$0xff]  }
  0xfd   :  { %1733 = vmatmul.mubr.bf16.vlgmr.msra.gmra.mrb[4].mxu1 %v3791_v11  ;;  %1594 = vmatpush1.bf16.msra.mxu0 %v3283_v46  ;;  %v3325_v11 = vld [vmem:[#allocation5 + $0x5e0] ss:$16 sps:$4 sm:$0xff]   ;;  %v3359_v46 = vld [vmem:[#allocation5 + $0x60c] ss:$16 sps:$4 sm:$0xff]  }
  0xfe   :  { %1742 = vmatpush1.bf16.msra.mxu1 %v3286_v47  ;;  %1595 = vmatprep.subr.bf16.mxu0 %v3291_v48  ;;  %v3407_v47 = vld [vmem:[#allocation7 + $0x84] ss:$8 sps:$4 sm:$0xff]   ;;  %v3357_v48 = vld [vmem:[#allocation5 + $0x608] ss:$16 sps:$4 sm:$0xff]  }
  0xff   :  { %1743 = vmatprep.subr.bf16.mxu1 %v3294_v49  ;;  %1773 = vmatprep.mubr.bf16.mxu1 %v3797_v17  ;;  %v3381_v17 = vld [vmem:[#allocation7] ss:$8 sps:$4 sm:$0xff]   ;;  %v3362_v49 = vld [vmem:[#allocation5 + $0x62c] ss:$16 sps:$4 sm:$0xff]  }
 0x101   :  { %1596 = vmatpush1.bf16.msra.mxu0 %v3289_v50  ;;  %v3405_v50 = vld [vmem:[#allocation7 + $0x80] ss:$8 sps:$4 sm:$0xff]  }
 0x102   :  { %1744 = vmatpush1.bf16.msra.mxu1 %v3292_v51  ;;  %1597 = vmatprep.subr.bf16.mxu0 %v3297_v52  ;;  %v3410_v51 = vld [vmem:[#allocation7 + $0x94] ss:$8 sps:$4 sm:$0xff]   ;;  %v3360_v52 = vld [vmem:[#allocation5 + $0x628] ss:$16 sps:$4 sm:$0xff]  }
 0x103   :  { %1745 = vmatprep.subr.bf16.mxu1 %v3300_v53  ;;  %v3365_v53 = vld [vmem:[#allocation5 + $0x64c] ss:$16 sps:$4 sm:$0xff]  }
 0x105   :  { %1598 = vmatpush1.bf16.msra.mxu0 %v3295_v54  ;;  %v3408_v54 = vld [vmem:[#allocation7 + $0x90] ss:$8 sps:$4 sm:$0xff]  }
 0x106   :  { %1746 = vmatpush1.bf16.msra.mxu1 %v3298_v55  ;;  %1599 = vmatprep.subr.bf16.mxu0 %v3303_v56  ;;  %v3413_v55 = vld [vmem:[#allocation7 + $0xa4] ss:$8 sps:$4 sm:$0xff]   ;;  %v3363_v56 = vld [vmem:[#allocation5 + $0x648] ss:$16 sps:$4 sm:$0xff]  }
 0x107   :  { %1747 = vmatprep.subr.bf16.mxu1 %v3306_v57  ;;  %v3368_v57 = vld [vmem:[#allocation5 + $0x66c] ss:$16 sps:$4 sm:$0xff]  }
 0x109   :  { %1600 = vmatpush1.bf16.msra.mxu0 %v3301_v58  ;;  %v3411_v58 = vld [vmem:[#allocation7 + $0xa0] ss:$8 sps:$4 sm:$0xff]  }
 0x10a   :  { %1748 = vmatpush1.bf16.msra.mxu1 %v3304_v59  ;;  %1601 = vmatprep.subr.bf16.mxu0 %v3309_v60  ;;  %v3416_v59 = vld [vmem:[#allocation7 + $0xb4] ss:$8 sps:$4 sm:$0xff]   ;;  %v3366_v60 = vld [vmem:[#allocation5 + $0x668] ss:$16 sps:$4 sm:$0xff]  }
 0x10b   :  { %1749 = vmatprep.subr.bf16.mxu1 %v3312_v61  ;;  %v3371_v61 = vld [vmem:[#allocation5 + $0x68c] ss:$16 sps:$4 sm:$0xff]  }
 0x10d   :  { %1602 = vmatpush1.bf16.msra.mxu0 %v3307_v62  ;;  %v3419_v62 = vld [vmem:[#allocation7 + $0xc4] ss:$8 sps:$4 sm:$0xff]  }
 0x10e   :  { %1750 = vmatpush1.bf16.msra.mxu1 %v3310_v63  ;;  %1603 = vmatprep.subr.bf16.mxu0 %v3315_v1  ;;  %v3369_v63 = vld [vmem:[#allocation5 + $0x688] ss:$16 sps:$4 sm:$0xff]   ;;  %v3374_v1 = vld [vmem:[#allocation5 + $0x6ac] ss:$16 sps:$4 sm:$0xff]  }
 0x10f   :  { %1751 = vmatprep.subr.bf16.mxu1 %v3318_v2  ;;  %v3417_v2 = vld [vmem:[#allocation7 + $0xc0] ss:$8 sps:$4 sm:$0xff]  }
 0x111   :  { %1604 = vmatpush1.bf16.msra.mxu0 %v3313_v3  ;;  %v3422_v3 = vld [vmem:[#allocation7 + $0xd4] ss:$8 sps:$4 sm:$0xff]  }
 0x112   :  { %1752 = vmatpush1.bf16.msra.mxu1 %v3316_v4  ;;  %1605 = vmatprep.subr.bf16.mxu0 %v3321_v5  ;;  %v3372_v4 = vld [vmem:[#allocation5 + $0x6a8] ss:$16 sps:$4 sm:$0xff]   ;;  %v3377_v5 = vld [vmem:[#allocation5 + $0x6cc] ss:$16 sps:$4 sm:$0xff]  }
 0x113   :  { %1753 = vmatprep.subr.bf16.mxu1 %v3324_v6  ;;  %v3420_v6 = vld [vmem:[#allocation7 + $0xd0] ss:$8 sps:$4 sm:$0xff]  }
 0x115   :  { %1606 = vmatpush1.bf16.msra.mxu0 %v3319_v7 }
 0x116   :  { %1754 = vmatpush1.bf16.msra.mxu1 %v3322_v8  ;;  %1607 = vmatprep.subr.bf16.mxu0 %v3327_v9 }
 0x117   :  { %1755 = vmatprep.subr.bf16.mxu1 %v3330_v10  ;;  %v3375_v10 = vld [vmem:[#allocation5 + $0x6c8] ss:$16 sps:$4 sm:$0xff]  }
 0x119   :  { %1608 = vmatpush1.bf16.msra.mxu0 %v3325_v11 }
 0x11a   :  { %1756 = vmatpush1.bf16.msra.mxu1 %v3328_v12  ;;  %2227 = vmatprep.subr.bf16.mxu0 %v3383_v14  ;;  %v3380_v12 = vld [vmem:[#allocation5 + $0x6ec] ss:$16 sps:$4 sm:$0xff]  }
 0x11b   :  { %1757 = vmatprep.subr.bf16.mxu1 %v3335_v13  ;;  %v3378_v13 = vld [vmem:[#allocation5 + $0x6e8] ss:$16 sps:$4 sm:$0xff]   ;;  %v3501_v14 = vld [vmem:[#allocation2 + $0x18] ss:$0 sps:$4 sm:$0xff]  }
 0x11c   :  { %1610 = vmatmul.mubr.bf16.vlgmr.msra.gmra.mrb[0].mxu0 %v3805_v18 }
 0x11d   :  { %2228 = vmatpush1.bf16.msra.mxu0 %v3381_v17  ;;  %v3423_v17 = vld [vmem:[#allocation7 + $0xe0] ss:$8 sps:$4 sm:$0xff]  }
 0x11e   :  { %1758 = vmatpush1.bf16.msra.mxu1 %v3333_v15  ;;  %2229 = vmatprep.subr.bf16.mxu0 %v3386_v20  ;;  %v3425_v15 = vld [vmem:[#allocation7 + $0xe4] ss:$8 sps:$4 sm:$0xff]  }
 0x11f   :  { %1759 = vmatprep.subr.bf16.mxu1 %v3338_v19  ;;  %v3426_v19 = vld [vmem:[#allocation7 + $0xf0] ss:$8 sps:$4 sm:$0xff]   ;;  %v3431_v20 = vld [vmem:[#allocation7 + $0x104] ss:$8 sps:$4 sm:$0xff]  }
 0x121   :  { %2230 = vmatpush1.bf16.msra.mxu0 %v3384_v22  ;;  %v3478_v22 = vld [vmem:[#allocation8] sm:$0xff]  }
 0x122   :  { %1760 = vmatpush1.bf16.msra.mxu1 %v3336_v21  ;;  %2231 = vmatprep.subr.bf16.mxu0 %v3389_v24  ;;  %v3477_v21 = vld [vmem:[#allocation8 + $0x40] sm:$0xff]   ;;  %v3480_v24 = vld [vmem:[#allocation8 + $0x8] sm:$0xff]  }
 0x123   :  { %1761 = vmatprep.subr.bf16.mxu1 %v3341_v23  ;;  %v3479_v23 = vld [vmem:[#allocation8 + $0x48] sm:$0xff]  }
 0x125   :  { %2232 = vmatpush1.bf16.msra.mxu0 %v3387_v16  ;;  %v3482_v16 = vld [vmem:[#allocation8 + $0x10] sm:$0xff]  }
 0x126   :  { %1762 = vmatpush1.bf16.msra.mxu1 %v3339_v25  ;;  %2233 = vmatprep.subr.bf16.mxu0 %v3392_v27  ;;  %v3481_v25 = vld [vmem:[#allocation8 + $0x50] sm:$0xff]   ;;  %v3484_v27 = vld [vmem:[#allocation8 + $0x18] sm:$0xff]  }
 0x127   :  { %1763 = vmatprep.subr.bf16.mxu1 %v3344_v26  ;;  %v3483_v26 = vld [vmem:[#allocation8 + $0x58] sm:$0xff]  }
 0x129   :  { %2234 = vmatpush1.bf16.msra.mxu0 %v3390_v29  ;;  %v3486_v29 = vld [vmem:[#allocation8 + $0x20] sm:$0xff]  }
 0x12a   :  { %1764 = vmatpush1.bf16.msra.mxu1 %v3342_v28  ;;  %2235 = vmatprep.subr.bf16.mxu0 %v3395_v31  ;;  %v3485_v28 = vld [vmem:[#allocation8 + $0x60] sm:$0xff]   ;;  %v3488_v31 = vld [vmem:[#allocation8 + $0x28] sm:$0xff]  }
 0x12b   :  { %1765 = vmatprep.subr.bf16.mxu1 %v3347_v30  ;;  %v3487_v30 = vld [vmem:[#allocation8 + $0x68] sm:$0xff]  }
 0x12d   :  { %2236 = vmatpush1.bf16.msra.mxu0 %v3393_v33 }
 0x12e   :  { %1766 = vmatpush1.bf16.msra.mxu1 %v3345_v32  ;;  %2237 = vmatprep.subr.bf16.mxu0 %v3398_v35  ;;  %v330_v32 = vlaneseq  ;;  %v3816_v35 = vld [vmem:[%s3856_s2] sm:$0xf] }
 0x12f   :  { %1767 = vmatprep.subr.bf16.mxu1 %v3350_v34 }
 0x130   :  { %v3810_v33 = vshrl.u32 %v330_v32, 7  ;;  %v3489_v32 = vld [vmem:[#allocation8 + $0x70] sm:$0xff]  }
 0x131   :  { %2238 = vmatpush1.bf16.msra.mxu0 %v3396_v37 }
 0x132   :  { %1768 = vmatpush1.bf16.msra.mxu1 %v3348_v36  ;;  %2239 = vmatprep.subr.bf16.mxu0 %v3401_v39  ;;  %v332_v34 = vsub.s32 0, %v3810_v33  ;;  %v336_v36 = vsub.s32 1, %v3810_v33 }
 0x133   :  { %1769 = vmatprep.subr.bf16.mxu1 %v3353_v38 }
 0x134   :  { %v333_v37 = vrot.slane %v3816_v35, %v332_v34  ;;  %v337_v38 = vrot.slane %v3816_v35, %v336_v36 }
 0x135   :  { %2240 = vmatpush1.bf16.msra.mxu0 %v3399_v41 }
 0x136   :  { %1770 = vmatpush1.bf16.msra.mxu1 %v3351_v40  ;;  %2241 = vmatprep.subr.bf16.mxu0 %v3404_v43 }
 0x137   :  { %1771 = vmatprep.subr.bf16.mxu1 %v3356_v42 }
 0x139   :  { %2242 = vmatpush1.bf16.msra.mxu0 %v3402_v45 }
 0x13a   :  { %1772 = vmatpush1.bf16.msra.mxu1 %v3354_v44  ;;  %2243 = vmatprep.subr.bf16.mxu0 %v3407_v47 }
 0x13b   :  { %1782 = vmatprep.subr.bf16.mxu1 %v3359_v46 }
 0x13d   :  { %1774 = vmatmul.mubr.bf16.vlgmr.msra.gmra.mrb[4].mxu1 %v3805_v18  ;;  %2244 = vmatpush1.bf16.msra.mxu0 %v3405_v50  ;;  %v3428_v18 = vld [vmem:[#allocation7 + $0xf4] ss:$8 sps:$4 sm:$0xff]   ;;  %v3429_v50 = vld [vmem:[#allocation7 + $0x100] ss:$8 sps:$4 sm:$0xff]  }
 0x13e   :  { %1783 = vmatpush1.bf16.msra.mxu1 %v3357_v48  ;;  %1814 = vmatprep.mubr.bf16.mxu1 %v3653_v0  ;;  %v3414_v0 = vld [vmem:[#allocation7 + $0xb0] ss:$8 sps:$4 sm:$0xff]  }
 0x13f   :  { %1784 = vmatprep.subr.bf16.mxu1 %v3362_v49  ;;  %2245 = vmatprep.subr.bf16.mxu0 %v3410_v51 }
 0x141   :  { %2246 = vmatpush1.bf16.msra.mxu0 %v3408_v54  ;;  %v3437_v54 = vld [vmem:[#allocation7 + $0x124] ss:$8 sps:$4 sm:$0xff]  }
 0x142   :  { %1785 = vmatpush1.bf16.msra.mxu1 %v3360_v52  ;;  %2247 = vmatprep.subr.bf16.mxu0 %v3413_v55  ;;  %v3434_v52 = vld [vmem:[#allocation7 + $0x114] ss:$8 sps:$4 sm:$0xff]   ;;  %v3435_v55 = vld [vmem:[#allocation7 + $0x120] ss:$8 sps:$4 sm:$0xff]  }
 0x143   :  { %1786 = vmatprep.subr.bf16.mxu1 %v3365_v53  ;;  %v3432_v53 = vld [vmem:[#allocation7 + $0x110] ss:$8 sps:$4 sm:$0xff]  }
 0x145   :  { %2248 = vmatpush1.bf16.msra.mxu0 %v3411_v58  ;;  %v3443_v58 = vld [vmem:[#allocation7 + $0x144] ss:$8 sps:$4 sm:$0xff]  }
 0x146   :  { %1787 = vmatpush1.bf16.msra.mxu1 %v3363_v56  ;;  %2249 = vmatprep.subr.bf16.mxu0 %v3416_v59  ;;  %v3440_v56 = vld [vmem:[#allocation7 + $0x134] ss:$8 sps:$4 sm:$0xff]   ;;  %v3441_v59 = vld [vmem:[#allocation7 + $0x140] ss:$8 sps:$4 sm:$0xff]  }
 0x147   :  { %1788 = vmatprep.subr.bf16.mxu1 %v3368_v57  ;;  %v3438_v57 = vld [vmem:[#allocation7 + $0x130] ss:$8 sps:$4 sm:$0xff]  }
 0x149   :  { %2250 = vmatpush1.bf16.msra.mxu0 %v3414_v0  ;;  %v3449_v0 = vld [vmem:[#allocation7 + $0x164] ss:$8 sps:$4 sm:$0xff]  }
 0x14a   :  { %1789 = vmatpush1.bf16.msra.mxu1 %v3366_v60  ;;  %2251 = vmatprep.subr.bf16.mxu0 %v3419_v62  ;;  %v3446_v60 = vld [vmem:[#allocation7 + $0x154] ss:$8 sps:$4 sm:$0xff]   ;;  %v3447_v62 = vld [vmem:[#allocation7 + $0x160] ss:$8 sps:$4 sm:$0xff]  }
 0x14b   :  { %1790 = vmatprep.subr.bf16.mxu1 %v3371_v61  ;;  %v3444_v61 = vld [vmem:[#allocation7 + $0x150] ss:$8 sps:$4 sm:$0xff]  }
 0x14d   :  { %2252 = vmatpush1.bf16.msra.mxu0 %v3417_v2  ;;  %v3455_v2 = vld [vmem:[#allocation7 + $0x184] ss:$8 sps:$4 sm:$0xff]  }
 0x14e   :  { %1791 = vmatpush1.bf16.msra.mxu1 %v3369_v63  ;;  %2253 = vmatprep.subr.bf16.mxu0 %v3422_v3  ;;  %v3452_v63 = vld [vmem:[#allocation7 + $0x174] ss:$8 sps:$4 sm:$0xff]   ;;  %v3453_v3 = vld [vmem:[#allocation7 + $0x180] ss:$8 sps:$4 sm:$0xff]  }
 0x14f   :  { %1792 = vmatprep.subr.bf16.mxu1 %v3374_v1  ;;  %v3450_v1 = vld [vmem:[#allocation7 + $0x170] ss:$8 sps:$4 sm:$0xff]  }
 0x150   :  { %v1652_v7 = vpop.f32.mrb[0].mxu1 }
 0x151   :  { %v1654_v8 = vpop.f32.mrb[1].mxu1  ;;  %2254 = vmatpush1.bf16.msra.mxu0 %v3420_v6  ;;  %v3461_v6 = vld [vmem:[#allocation7 + $0x1a4] ss:$8 sps:$4 sm:$0xff]  }
 0x152   :  { %v1656_v9 = vpop.f32.mrb[2].mxu1  ;;  %1793 = vmatpush1.bf16.msra.mxu1 %v3372_v4  ;;  %2255 = vmatprep.subr.bf16.mxu0 %v3425_v15  ;;  %v3458_v4 = vld [vmem:[#allocation7 + $0x194] ss:$8 sps:$4 sm:$0xff]   ;;  %v3468_v15 = vld [vmem:[#allocation7 + $0x1d0] ss:$8 sps:$4 sm:$0xff]  }
 0x153   :  { %v1657_v11 = vpop.f32.mrb[3].mxu1  ;;  %1794 = vmatprep.subr.bf16.mxu1 %v3377_v5  ;;  %v3456_v5 = vld [vmem:[#allocation7 + $0x190] ss:$8 sps:$4 sm:$0xff]  }
 0x154   :  { %v3462_v9 = vld [vmem:[#allocation7 + $0x1b0] ss:$8 sps:$4 sm:$0xff]   ;;  %v3465_v11 = vld [vmem:[#allocation7 + $0x1c0] ss:$8 sps:$4 sm:$0xff]  }
 0x155   :  { %2256 = vmatpush1.bf16.msra.mxu0 %v3423_v17 }
 0x156   :  { %1795 = vmatpush1.bf16.msra.mxu1 %v3375_v10  ;;  %2257 = vmatprep.subr.bf16.mxu0 %v3428_v18  ;;  %v3467_v10 = vld [vmem:[#allocation7 + $0x1c4] ss:$8 sps:$4 sm:$0xff]  }
 0x157   :  { %1796 = vmatprep.subr.bf16.mxu1 %v3380_v12  ;;  %v3470_v12 = vld [vmem:[#allocation7 + $0x1d4] ss:$8 sps:$4 sm:$0xff]   ;;  %v3473_v18 = vld [vmem:[#allocation7 + $0x1e4] ss:$8 sps:$4 sm:$0xff]  }
 0x159   :  { %2258 = vmatpush1.bf16.msra.mxu0 %v3426_v19 }
 0x15a   :  { %1797 = vmatpush1.bf16.msra.mxu1 %v3378_v13  ;;  %2268 = vmatprep.subr.bf16.mxu0 %v3431_v20  ;;  %v340_v13 = vsub.s32 2, %v3810_v33 }
 0x15b   :  { %2940 = vmatprep.subr.bf16.mxu1 %v3477_v21  ;;  %v3471_v21 = vld [vmem:[#allocation7 + $0x1e0] ss:$8 sps:$4 sm:$0xff]  }
 0x15c   :  { %v341_v17 = vrot.slane %v3816_v35, %v340_v13 }
 0x15d   :  { %1815 = vmatmul.mubr.bf16.vlgmr.msra.gmra.mrb[4].mxu1 %v3501_v14  ;;  %v344_v14 = vsub.s32 3, %v3810_v33  ;;  %v3496_v33 = vld [vmem:[#allocation10 + $0x18] sm:$0xff]  }
 0x15e   :  { %2941 = vmatpush3.bf16.msra.mxu1 %v3478_v22 }
 0x15f   :  { %2942 = vmatprep.subr.bf16.mxu1 %v3479_v23  ;;  %v345_v19 = vrot.slane %v3816_v35, %v344_v14  ;;  %v3490_v35 = vld [vmem:[#allocation8 + $0x30] sm:$0xff]  }
 0x162   :  { %2943 = vmatpush3.bf16.msra.mxu1 %v3480_v24  ;;  %v3476_v24 = vld [vmem:[#allocation7 + $0x1f4] ss:$8 sps:$4 sm:$0xff]  }
 0x163   :  { %2944 = vmatprep.subr.bf16.mxu1 %v3481_v25 }
 0x166   :  { %2945 = vmatpush3.bf16.msra.mxu1 %v3482_v16 }
 0x167   :  { %2946 = vmatprep.subr.bf16.mxu1 %v3483_v26 }
 0x16a   :  { %2947 = vmatpush3.bf16.msra.mxu1 %v3484_v27 }
 0x16b   :  { %2948 = vmatprep.subr.bf16.mxu1 %v3485_v28  ;;  %v3474_v28 = vld [vmem:[#allocation7 + $0x1f0] ss:$8 sps:$4 sm:$0xff]  }
 0x16e   :  { %2949 = vmatpush3.bf16.msra.mxu1 %v3486_v29 }
 0x16f   :  { %2950 = vmatprep.subr.bf16.mxu1 %v3487_v30 }
 0x172   :  { %2951 = vmatpush3.bf16.msra.mxu1 %v3488_v31 }
 0x173   :  { %2952 = vmatprep.subr.bf16.mxu1 %v3489_v32 }
 0x176   :  { %2953 = vmatpush3.bf16.msra.mxu1 %v3490_v35 }
 0x1ef   :  { %v1611_v39 = vpop.f32.mrb[0].mxu0 }
 0x1f0   :  { %v2991_v40 = vadd.f32 %v1611_v39, %v333_v37  ;;  %v1613_v41 = vpop.f32.mrb[1].mxu0  ;;  %v3491_v37 = vld [vmem:[#allocation8 + $0x78] sm:$0xff]   ;;  %v3654_v39 = vmov 0.0  }
 0x1f1   :  { %v2993_v42 = vadd.f32 %v1613_v41, %v337_v38  ;;  %v1615_v43 = vpop.f32.mrb[2].mxu0  ;;  %v3492_v38 = vld [vmem:[#allocation8 + $0x38] sm:$0xff]   ;;  %2954 = vmatprep.subr.bf16.mxu1 %v3491_v37 }
 0x1f2   :  { %v2992_v44 = vadd.f32 %v2991_v40, %v1652_v7  ;;  %v1616_v45 = vpop.f32.mrb[3].mxu0  ;;  %v3459_v7 = vld [vmem:[#allocation7 + $0x1a0] ss:$8 sps:$4 sm:$0xff]   ;;  %2955 = vmatpush3.bf16.msra.mxu1 %v3492_v38  ;;  %v1895_v40 = vld [vmem:[%s3858_s4] sm:$0x3] }
 0x1f3   :  { %v2994_v46 = vadd.f32 %v2993_v42, %v1654_v8  ;;  %v3464_v8 = vld [vmem:[#allocation7 + $0x1b4] ss:$8 sps:$4 sm:$0xff]   ;;  %2971 = vmatprep.subr.bf16.mxu1 %v3654_v39  ;;  %v1900_v41 = vrot.slane %v1895_v40, %v332_v34  ;;  %v1904_v42 = vrot.slane %v1895_v40, %v336_v36  ;;  %v3497_v36 = vld [vmem:[#allocation10 + $0x20] sm:$0xff]  }
 0x1f4   :  { %v1823_v47 = vmax.f32 %v2992_v44, 0.0  ;;  %v3495_v34 = vld [vmem:[#allocation10 + $0x10] sm:$0xff]  }
 0x1f5   :  { %v1824_v48 = vmax.f32 %v2994_v46, 0.0 }
 0x1f6   :  { %v1827_v51 = vpack.c.bf16 %v1823_v47, %v1823_v47 }
 0x1f7   :  { %v1828_v49 = vpack.c.bf16 %v1824_v48, %v1824_v48 }
 0x1f9   :  { %2259 = vmatprep.mubr.bf16.mxu0 %v1828_v49 }
 0x1fa   :  { %2260 = vmatmul.mubr.bf16.vlgmr.msra.gmra.mrb[4].mxu0 %v1827_v51 }
 0x1fb   :  { %2269 = vmatpush1.bf16.msra.mxu0 %v3429_v50 }
 0x1fc   :  { %2270 = vmatprep.subr.bf16.mxu0 %v3434_v52  ;;  %v3493_v52 = vld [vmem:[#allocation10] sm:$0xff]  }
 0x1ff   :  { %2271 = vmatpush1.bf16.msra.mxu0 %v3432_v53 }
 0x200   :  { %2272 = vmatprep.subr.bf16.mxu0 %v3437_v54  ;;  %v3494_v54 = vld [vmem:[#allocation10 + $0x8] sm:$0xff]  }
 0x203   :  { %2273 = vmatpush1.bf16.msra.mxu0 %v3435_v55  ;;  %v3498_v55 = vld [vmem:[#allocation10 + $0x28] sm:$0xff]  }
 0x204   :  { %2274 = vmatprep.subr.bf16.mxu0 %v3440_v56  ;;  %v3499_v56 = vld [vmem:[#allocation10 + $0x30] sm:$0xff]  }
 0x207   :  { %2275 = vmatpush1.bf16.msra.mxu0 %v3438_v57  ;;  %v3500_v57 = vld [vmem:[#allocation10 + $0x38] sm:$0xff]  }
 0x208   :  { %2276 = vmatprep.subr.bf16.mxu0 %v3443_v58 }
 0x20b   :  { %2277 = vmatpush1.bf16.msra.mxu0 %v3441_v59  ;;  %v2914_v59 = vld [vmem:[%s3860_s6] ss:$0 sm:$0xff]  ;;  %s3612_s6 = scalar_lea.vmem %s2609_s13, 128 }
 0x20c   :  { %2278 = vmatprep.subr.bf16.mxu0 %v3446_v60  ;;  %p3613_p12 = scmp.ne.s32.totalorder %s2609_s13, %s3612_s6  ;;  %p3618_p0 = scmp.lt.s32.totalorder %s3612_s6, %s3612_s6 }
 0x20e   :  { %p3619_p1 = por %p3618_p0, %p3617_p13 }
 0x20f   :  { %2279 = vmatpush1.bf16.msra.mxu0 %v3444_v61 }
 0x210   :  { %2280 = vmatprep.subr.bf16.mxu0 %v3449_v0  ;;  %p3620_p2 = pnand %p3619_p1, %p3613_p12 }
 0x213   :  { %2281 = vmatpush1.bf16.msra.mxu0 %v3447_v62 }
 0x214   :  { %2282 = vmatprep.subr.bf16.mxu0 %v3452_v63 }
 0x217   :  { %2283 = vmatpush1.bf16.msra.mxu0 %v3450_v1 }
 0x218   :  { %2284 = vmatprep.subr.bf16.mxu0 %v3455_v2 }
 0x21b   :  { %2285 = vmatpush1.bf16.msra.mxu0 %v3453_v3  ;;  %v2931_v3 = vld [vmem:[%s3862_s8] ss:$0 sm:$0xff] }
 0x21c   :  { %2286 = vmatprep.subr.bf16.mxu0 %v3458_v4 }
 0x21f   :  { %2287 = vmatpush1.bf16.msra.mxu0 %v3456_v5 }
 0x220   :  { %2288 = vmatprep.subr.bf16.mxu0 %v3461_v6 }
 0x223   :  { %2289 = vmatpush1.bf16.msra.mxu0 %v3459_v7 }
 0x224   :  { %2290 = vmatprep.subr.bf16.mxu0 %v3464_v8 }
 0x227   :  { %2291 = vmatpush1.bf16.msra.mxu0 %v3462_v9 }
 0x228   :  { %2292 = vmatprep.subr.bf16.mxu0 %v3467_v10 }
 0x22b   :  { %2293 = vmatpush1.bf16.msra.mxu0 %v3465_v11 }
 0x22c   :  { %2294 = vmatprep.subr.bf16.mxu0 %v3470_v12 }
 0x22f   :  { %2295 = vmatpush1.bf16.msra.mxu0 %v3468_v15 }
 0x230   :  { %v1816_v20 = vpop.f32.mrb[4].mxu1  ;;  %2296 = vmatprep.subr.bf16.mxu0 %v3473_v18 }
 0x231   :  { %v2995_v22 = vadd.f32 %v1816_v20, %v341_v17  ;;  %v1818_v23 = vpop.f32.mrb[5].mxu1 }
 0x232   :  { %v2996_v25 = vadd.f32 %v1818_v23, %v345_v19  ;;  %v1820_v16 = vpop.f32.mrb[6].mxu1 }
 0x233   :  { %v1821_v26 = vpop.f32.mrb[7].mxu1  ;;  %2297 = vmatpush1.bf16.msra.mxu0 %v3471_v21  ;;  %v1825_v29 = vmax.f32 %v2995_v22, 0.0 }
 0x234   :  { %v1826_v27 = vmax.f32 %v2996_v25, 0.0  ;;  %2298 = vmatprep.subr.bf16.mxu0 %v3476_v24 }
 0x235   :  { %v1829_v31 = vpack.c.bf16 %v1825_v29, %v1825_v29 }
 0x236   :  { %v1830_v30 = vpack.c.bf16 %v1826_v27, %v1826_v27 }
 0x237   :  { %2299 = vmatpush1.bf16.msra.mxu0 %v3474_v28 }
 0x238   :  { %2300 = vmatprep.mubr.bf16.mxu0 %v1830_v30 }
 0x23a   :  { %2301 = vmatmul.mubr.bf16.vlgmr.msra.gmra.mrb[4].mxu0 %v1829_v31 }
 0x30d   :  { %v2302_v43 = vpop.f32.mrb[4].mxu0 }
 0x30e   :  { %v2997_v44 = vadd.f32 %v2302_v43, %v1900_v41  ;;  %v2304_v45 = vpop.f32.mrb[5].mxu0 }
 0x30f   :  { %v2998_v46 = vadd.f32 %v2304_v45, %v1904_v42  ;;  %v2306_v47 = vpop.f32.mrb[6].mxu0 }
 0x310   :  { %v2309_v48 = vmax.f32 %v2997_v44, 0.0  ;;  %v2307_v49 = vpop.f32.mrb[7].mxu0 }
 0x311   :  { %v2310_v50 = vmax.f32 %v2998_v46, 0.0 }
 0x312   :  { %v2311_v53 = vpack.c.bf16 %v2309_v48, %v2309_v48 }
 0x313   :  { %v2312_v51 = vpack.c.bf16 %v2310_v50, %v2310_v50 }
 0x315   :  { %2480 = vmatprep.mubr.bf16.mxu1 %v2312_v51 }
 0x316   :  { %2481 = vmatmul.mubr.bf16.vlgmr.msra.gmra.mrb[8].mxu1 %v2311_v53 }
 0x317   :  { %2972 = vmatpush3.bf16.msra.mxu1 %v3493_v52  ;;  %2987 = vmatprep.mubr.msk.bf16.mxu1 %vm3655_vm0, %v3654_v39 }
 0x318   :  { %2973 = vmatprep.subr.bf16.mxu1 %v3654_v39 }
 0x31b   :  { %2974 = vmatpush3.bf16.msra.mxu1 %v3494_v54 }
 0x31c   :  { %2975 = vmatprep.subr.bf16.mxu1 %v3654_v39 }
 0x31f   :  { %2976 = vmatpush3.bf16.msra.mxu1 %v3495_v34 }
 0x320   :  { %2977 = vmatprep.subr.bf16.mxu1 %v3654_v39 }
 0x323   :  { %2978 = vmatpush3.bf16.msra.mxu1 %v3496_v33 }
 0x324   :  { %2979 = vmatprep.subr.bf16.mxu1 %v3654_v39 }
 0x327   :  { %2980 = vmatpush3.bf16.msra.mxu1 %v3497_v36 }
 0x328   :  { %2981 = vmatprep.subr.bf16.mxu1 %v3654_v39 }
 0x32b   :  { %2982 = vmatpush3.bf16.msra.mxu1 %v3498_v55 }
 0x32c   :  { %2983 = vmatprep.subr.bf16.mxu1 %v3654_v39 }
 0x32f   :  { %2984 = vmatpush3.bf16.msra.mxu1 %v3499_v56 }
 0x330   :  { %2985 = vmatprep.subr.bf16.mxu1 %v3654_v39 }
 0x333   :  { %2986 = vmatpush3.bf16.msra.mxu1 %v3500_v57 }
 0x3e9   :  { %v2956_v58 = vpop.f32.mrb[8].mxu1 }
 0x3ea   :  { %v2957_v60 = vpop.f32.mrb[9].mxu1 }
 0x3eb   :  { %v2958_v61 = vadd.f32 %v2957_v60, %v2956_v58  ;;  %v2959_v0 = vpop.f32.mrb[10].mxu1 }
 0x3ec   :  { %v2960_v62 = vpop.f32.mrb[11].mxu1 }
 0x3ed   :  { %v2483_v63 = vadd.f32 %v2958_v61, %v2914_v59 }
 0x3ef   :  { %v2488_v1 = vmax.f32 %v2483_v63, 0.0 }
 0x3f1   :  { %v2489_v2 = vpack.c.bf16 %v2488_v1, %v2488_v1 }
 0x3f3   :  { %2988 = vmatmul.mubr.bf16.vlgmr.msra.gmra.mrb[12].mxu1 %v2489_v2 }
 0x4c6   :  { %v2595_v4 = vpop.f32.mrb[12].mxu1 }
 0x4c7   :  { %v2596_v5 = vadd.f32 %v2931_v3, %v2595_v4  ;;  %v2989_v6 = vpop.f32.mrb[13].mxu1 }
 0x4c8   :  { %v2598_v7 = vpop.f32.mrb[14].mxu1 }
 0x4c9   :  { %2601 = vst [vmem:[#allocation11] sm:$0xff] %v2596_v5  ;;  %v2990_v8 = vpop.f32.mrb[15].mxu1 }
 0x4ca   :  { %3623 = shalt.err (!%p3620_p2)
}
 0x4cb   :  { %s3624_s8 = scalar_lea.hbm %s3863_s9, 128 }
 0x4cc   :  { %p3625_p3 = scmp.ne.s32.totalorder %s3863_s9, %s3624_s8  ;;  %p3628_p4 = scmp.lt.u32.totalorder %s3624_s8, %s3863_s9 }
 0x4ce   :  { %p3630_p5 = pnand %p3628_p4, %p3625_p3 }
 0x4d0   :  { %3633 = shalt.err (!%p3630_p5)
}
 0x4d1   :  { %2611 = dma.vmem_to_hbm [thread:$0]  %s2609_s13, 128, %s3863_s9, [#allocation4]  }
 0x4d2   :  { %3640 = dma.done.wait [#allocation4], 128  }
 0x4d3   :  { %3641 = vsyncadd [#allocation4], 4294967168 }
 0x4d4   :  { %2615 = vsyncpa [#allocation3], 1 }
 0x4d5   :  { %2616 = vsyncpa [#allocation6], 1 }
 0x4d6   :  { %2617 = vsyncpa [#allocation9], 1 }
 0x4d7   :  { %2618 = vsyncpa [#allocation4], 1 }

</bundles_post_ra>
